<compile_context>
chip_gen: v5e
topology: v5e:2x2
jax: 0.10.0
libtpu: 0.0.40
codegen_flags: <defaults>
</compile_context>

<pallas_src>
import jax
import jax.numpy as jnp
from jax.experimental import pallas as pl
from jax.experimental.pallas import tpu as pltpu


# ---------------------------------------------------------------------------
# Fused decoder kernel (one grid step = one image x one row tile)
# ---------------------------------------------------------------------------
def _decoder_fused_kernel(x1_ref, x2_ref, wup_ref, bup_ref, wc_ref, bc_ref,
                          o_ref, p_ref):
    # x1_ref : (1, H, W, Cin)        deconv input, channels-last
    # x2_ref : (1, H, 2, W, 2, Cs)   skip connection, parity-separated view
    # wup_ref: (4, Cin, Cu)          deconv weight, tap-major (tap = 2*a + b)
    # bup_ref: (1, Cu)               deconv bias (fp32)
    # wc_ref : (3, 3, Cm, Co)        conv weight, HWIO
    # bc_ref : (1, Co)               conv bias (fp32)
    # o_ref  : (1, TI, 2, W, 2, Co)  output row tile, parity-separated view
    # p_ref  : (4, TI+2, W+2, Cm)    scratch: zero-framed cat(up, skip) planes
    t = pl.program_id(1)
    T = pl.num_programs(1)

    TI = o_ref.shape[1]
    W = o_ref.shape[3]
    Cin = x1_ref.shape[3]
    Cu = wup_ref.shape[2]
    Cm = p_ref.shape[3]
    Co = bc_ref.shape[1]
    cdt = p_ref.dtype

    i0 = pl.multiple_of(t * TI, TI)          # first x1/plane row of this tile

    # Hoisted small loads (weights/biases reused many times below).
    bup = bup_ref[...]                        # (1, Cu)  fp32
    bc = bc_ref[...]                          # (1, Co)  fp32
    wups = [wup_ref[k] for k in range(4)]     # 4 x (Cin, Cu)
    wcs = [[wc_ref[dy, dx] for dx in range(3)] for dy in range(3)]  # 9 x (Cm, Co)

    # ---- 1. zero only the 1-pixel halo FRAME of the plane scratch ----------
    # (interior rows/cols are fully overwritten below; clearing them would be
    #  a wasted store pass on the scarcest slot)
    zrow = jnp.zeros((4, 1, W + 2, Cm), cdt)
    p_ref[:, 0:1, :, :] = zrow
    p_ref[:, TI + 1:TI + 2, :, :] = zrow
    zcol = jnp.zeros((4, TI + 2, 1, Cm), cdt)
    p_ref[:, :, 0:1, :] = zcol
    p_ref[:, :, W + 1:W + 2, :] = zcol

    # ---- 2. per-tile ConvTranspose2d(k=2, s=2) + in-VMEM concat with skip --
    # up[2i+a, 2j+b, cu] = x1[i, j, :] @ Wup[2a+b] + b_up : every input pixel
    # owns a disjoint 2x2 output block, so the deconv is 4 clean matmuls and
    # the 2x interleave is never materialised (parity planes instead).
    def build_rows(src_row, dst_row, nrows):
        xw = x1_ref[0, pl.ds(src_row, nrows), :, :].reshape(nrows * W, Cin)
        for a in range(2):
            x2a = x2_ref[0, pl.ds(src_row, nrows), a]         # (nrows, W, 2, Cs)
            for b in range(2):
                tap = a * 2 + b
                up = jnp.dot(xw, wups[tap],
                             preferred_element_type=jnp.float32) + bup
                p_ref[tap, pl.ds(dst_row, nrows), 1:W + 1, 0:Cu] = (
                    up.reshape(nrows, W, Cu).astype(cdt))
                p_ref[tap, pl.ds(dst_row, nrows), 1:W + 1, Cu:Cm] = (
                    x2a[:, :, b, :].astype(cdt))

    build_rows(i0, 1, TI)                     # interior rows of this tile

    @pl.when(t > 0)
    def _top_halo():                          # plane row i0-1 (zero pad at t==0)
        build_rows(i0 - 1, 0, 1)

    @pl.when(t < T - 1)
    def _bottom_halo():                       # plane row i0+TI (zero pad at t==T-1)
        build_rows(i0 + TI, TI + 1, 1)

    # ---- 3. 3x3 conv + bias + ReLU: 9 accumulated K=Cm dots per parity -----
    # (no im2col materialisation; slabs are read straight from p_ref views)
    # NOTE: the dj = -1/+1 column taps are offset-1 sublane slices; pltpu.roll
    # could take them off the load slot but is a micro-opt left out for clarity.
    for py in range(2):
        px_blocks = []
        for px in range(2):
            acc = jnp.zeros((TI * W, Co), jnp.float32)
            for dy in range(3):
                sy = py + dy - 1
                a, di = sy % 2, sy // 2       # source row parity / plane row offset
                for dx in range(3):
                    sx = px + dx - 1
                    b, dj = sx % 2, sx // 2   # source col parity / plane col offset
                    src = a * 2 + b
                    slab = p_ref[src, pl.ds(1 + di, TI),
                                 1 + dj:1 + dj + W, :]          # (TI, W, Cm)
                    acc = acc + jnp.dot(slab.reshape(TI * W, Cm), wcs[dy][dx],
                                        preferred_element_type=jnp.float32)
            out = jnp.maximum(acc + bc, 0.0)                    # fp32 epilogue
            px_blocks.append(out.reshape(TI, W, Co))
        # Interleave the two column parities at value level so the store hits
        # the full (2, Co) minor tile (no masked partial-lane writes).
        o_ref[0, :, py, :, :, :] = jnp.stack(px_blocks, axis=-2).astype(o_ref.dtype)


# ---------------------------------------------------------------------------
# Wrapper: NCHW in / NCHW out (PyTorch semantics)
# ---------------------------------------------------------------------------
def _choose_row_tile(H, W):
    """Pick TI (divides H): several pipeline steps per image, conv-matmul
    M = 4*TI*W in a healthy range, bounded per-step VMEM."""
    divisors = [d for d in range(1, H + 1) if H % d == 0]

    def badness(TI):
        T = H // TI
        M = 4 * TI * W
        s = 0.0
        if T < 4:
            s += 10.0 * (4 - T)            # want >= 4 pipeline steps per image
        if M < 512:
            s += (512 - M) / 512.0         # keep the MXU M dimension healthy
        if M > 2048:
            s += (M - 2048) / 2048.0       # bound per-step VMEM / latency
        return s

    return min(divisors, key=badness)


def decoder_forward(x1_nchw, x2_nchw, params):
    N, Cin, H, W = x1_nchw.shape
    Cs = x2_nchw.shape[1]
    Cu = params["up_w"].shape[1]          # ConvTranspose output channels
    Co = params["conv_w"].shape[0]        # conv output channels
    Cm = params["conv_w"].shape[1]        # = Cu + Cs
    assert Cm == Cu + Cs
    assert x2_nchw.shape == (N, Cs, 2 * H, 2 * W)

    cdt = x1_nchw.dtype   # matmul-operand / scratch dtype (bf16-capable; fp32 accum)

    # NCHW -> channels-last boundary transposes (required by the NCHW module
    # interface); everything downstream is zero-copy reshapes of NHWC data.
    x1 = jnp.transpose(x1_nchw, (0, 2, 3, 1))                            # (N,H,W,Cin)
    x2 = jnp.transpose(x2_nchw, (0, 2, 3, 1)).reshape(N, H, 2, W, 2, Cs)

    # ConvTranspose2d weight (Cin, Cu, 2, 2) -> tap-major (4, Cin, Cu)
    w_up = jnp.transpose(params["up_w"], (2, 3, 0, 1)).reshape(4, Cin, Cu).astype(cdt)
    b_up = params["up_b"].astype(jnp.float32).reshape(1, Cu)
    # Conv2d weight (Co, Cm, 3, 3) -> HWIO (3, 3, Cm, Co)
    w_c = jnp.transpose(params["conv_w"], (2, 3, 1, 0)).astype(cdt)
    b_c = params["conv_b"].astype(jnp.float32).reshape(1, Co)

    TI = _choose_row_tile(H, W)
    T = H // TI

    # Explicit VMEM budget with headroom, capped at v7x's 64 MiB physical VMEM.
    itemsize = jnp.dtype(cdt).itemsize
    block_bytes = (H * W * Cin + 4 * H * W * Cs) * itemsize              # x1 + x2
    weight_bytes = (4 * Cin * Cu + 9 * Cm * Co) * itemsize + (Cu + Co) * 4
    out_bytes = 4 * TI * W * Co * itemsize
    scratch_bytes = 4 * (TI + 2) * (W + 2) * Cm * itemsize
    tmp_bytes = 4 * TI * W * Co * 4 + TI * W * Cm * itemsize
    vmem_est = 2 * (block_bytes + weight_bytes + out_bytes) + scratch_bytes + tmp_bytes
    vmem_limit = int(min(max(2 * vmem_est, 32 * 1024 * 1024), 64 * 1024 * 1024))

    flops = (2 * N * H * W * Cin * 4 * Cu            # transposed conv
             + 2 * N * 4 * H * W * 9 * Cm * Co)      # 3x3 conv
    bytes_accessed = ((x1.size + x2.size + w_up.size + w_c.size) * itemsize
                      + (Cu + Co) * 4 + N * 4 * H * W * Co * itemsize)

    out = pl.pallas_call(
        _decoder_fused_kernel,
        out_shape=jax.ShapeDtypeStruct((N, H, 2, W, 2, Co), x1_nchw.dtype),
        grid_spec=pltpu.PrefetchScalarGridSpec(
            num_scalar_prefetch=0,
            grid=(N, T),
            in_specs=[
                pl.BlockSpec((1, H, W, Cin), lambda n, t: (n, 0, 0, 0)),
                pl.BlockSpec((1, H, 2, W, 2, Cs), lambda n, t: (n, 0, 0, 0, 0, 0)),
                pl.BlockSpec((4, Cin, Cu), lambda n, t: (0, 0, 0)),
                pl.BlockSpec((1, Cu), lambda n, t: (0, 0)),
                pl.BlockSpec((3, 3, Cm, Co), lambda n, t: (0, 0, 0, 0)),
                pl.BlockSpec((1, Co), lambda n, t: (0, 0)),
            ],
            out_specs=pl.BlockSpec((1, TI, 2, W, 2, Co),
                                   lambda n, t: (n, t, 0, 0, 0, 0)),
            scratch_shapes=[pltpu.VMEM((4, TI + 2, W + 2, Cm), cdt)],
        ),
        compiler_params=pltpu.CompilerParams(
            dimension_semantics=("parallel", "parallel"),
            vmem_limit_bytes=vmem_limit),
        cost_estimate=pl.CostEstimate(flops=int(flops), transcendentals=0,
                                      bytes_accessed=int(bytes_accessed)),
    )(x1, x2, w_up, b_up, w_c, b_c)

    # (N, H, 2, W, 2, Co) is a zero-copy view of NHWC (N, 2H, 2W, Co).
    out = out.reshape(N, 2 * H, 2 * W, Co)
    return jnp.transpose(out, (0, 3, 1, 2))       # NHWC -> NCHW


# ---------------------------------------------------------------------------
# Pure-JAX reference (same math, no Pallas) for a correctness sanity check.
# ---------------------------------------------------------------------------
def decoder_reference(x1_nchw, x2_nchw, params):
    x1 = jnp.transpose(x1_nchw, (0, 2, 3, 1))
    x2 = jnp.transpose(x2_nchw, (0, 2, 3, 1))
    N, H, W, _ = x1.shape
    Cu = params["up_w"].shape[1]
    Co = params["conv_w"].shape[0]

    # ConvTranspose2d k=2 s=2
    up = jnp.einsum("nhwc,coab->nhwabo", x1, params["up_w"]) + params["up_b"]
    up = jnp.transpose(up, (0, 1, 3, 2, 4, 5)).reshape(N, 2 * H, 2 * W, Cu)

    cat = jnp.concatenate([up, x2], axis=-1)
    x_pad = jnp.pad(cat, ((0, 0), (1, 1), (1, 1), (0, 0)))
    w = jnp.transpose(params["conv_w"], (2, 3, 1, 0))  # (3,3,Cm,Co)
    Ho, Wo = 2 * H, 2 * W
    acc = jnp.zeros((N, Ho, Wo, Co), jnp.float32)
    for dy in range(3):
        for dx in range(3):
            acc = acc + jnp.einsum("nhwc,co->nhwo",
                                   x_pad[:, dy:dy + Ho, dx:dx + Wo, :], w[dy, dx])
    out = jnp.maximum(acc + params["conv_b"], 0.0)
    return jnp.transpose(out, (0, 3, 1, 2))


if __name__ == "__main__":
    # Small decoder config: in_channels=8, out_channels=4, skip channels=4,
    # middle_channels = out_channels + skip = 8.
    in_ch, out_ch, skip_ch = 8, 4, 4
    mid_ch = out_ch + skip_ch
    N, H, W = 2, 8, 8                      # x1 spatial 8x8 -> upsampled 16x16

    key = jax.random.PRNGKey(0)
    k1, k2, k3, k4, k5, k6 = jax.random.split(key, 6)

    params = {
        # ConvTranspose2d weight: (in_ch, out_ch, 2, 2), bias: (out_ch,)
        "up_w": jax.random.normal(k1, (in_ch, out_ch, 2, 2), jnp.float32) * 0.1,
        "up_b": jax.random.normal(k2, (out_ch,), jnp.float32) * 0.1,
        # Conv2d weight: (out_ch, mid_ch, 3, 3), bias: (out_ch,)
        "conv_w": jax.random.normal(k3, (out_ch, mid_ch, 3, 3), jnp.float32) * 0.1,
        "conv_b": jax.random.normal(k4, (out_ch,), jnp.float32) * 0.1,
    }

    x1 = jax.random.normal(k5, (N, in_ch, H, W), jnp.float32)            # NCHW
    x2 = jax.random.normal(k6, (N, skip_ch, 2 * H, 2 * W), jnp.float32)  # NCHW skip

    out = jax.jit(decoder_forward)(x1, x2, params)
    out = jax.block_until_ready(out)

    ref = decoder_reference(x1, x2, params)
    assert out.shape == (N, out_ch, 2 * H, 2 * W), out.shape
    assert jnp.allclose(out, ref, atol=1e-4, rtol=1e-4), "mismatch vs reference"

    print("KERNEL_OK")
</pallas_src>

<mosaic_0001>
module attributes {stable_mosaic.version = 11 : i64} {
  func.func @_decoder_fused_kernel(%arg0: i32, %arg1: i32, %arg2: memref<1x8x8x8xf32, #tpu.memory_space<vmem>>, %arg3: memref<1x8x2x8x2x4xf32, #tpu.memory_space<vmem>>, %arg4: memref<4x8x4xf32, #tpu.memory_space<vmem>>, %arg5: memref<1x4xf32, #tpu.memory_space<vmem>>, %arg6: memref<3x3x8x4xf32, #tpu.memory_space<vmem>>, %arg7: memref<1x4xf32, #tpu.memory_space<vmem>>, %arg8: memref<1x2x2x8x2x4xf32, #tpu.memory_space<vmem>>, %arg9: memref<4x4x10x8xf32, #tpu.memory_space<vmem>>) attributes {dimension_semantics = [#tpu.dimension_semantics<parallel>, #tpu.dimension_semantics<parallel>], iteration_bounds = array<i64: 2, 4>, scalar_prefetch = 0 : i64, scratch_operands = 1 : i64, tpu.core_type = #tpu.core_type<tc>, window_params = [{transform_indices = @transform_0, window_bounds = array<i64: 1, 8, 8, 8>}, {transform_indices = @transform_1, window_bounds = array<i64: 1, 8, 2, 8, 2, 4>}, {pipeline_mode = #tpu.pipeline_mode<synchronous>, transform_indices = @transform_2, window_bounds = array<i64: 4, 8, 4>}, {pipeline_mode = #tpu.pipeline_mode<synchronous>, transform_indices = @transform_3, window_bounds = array<i64: 1, 4>}, {pipeline_mode = #tpu.pipeline_mode<synchronous>, transform_indices = @transform_4, window_bounds = array<i64: 3, 3, 8, 4>}, {pipeline_mode = #tpu.pipeline_mode<synchronous>, transform_indices = @transform_5, window_bounds = array<i64: 1, 4>}, {transform_indices = @transform_6, window_bounds = array<i64: 1, 2, 2, 8, 2, 4>}]} {
    %c2_i32 = arith.constant 2 : i32
    %0 = arith.muli %arg1, %c2_i32 : i32
    %1 = tpu.assume_multiple %0, 2 : i32
    %c0 = arith.constant 0 : index
    %c0_0 = arith.constant 0 : index
    %2 = vector.load %arg5[%c0, %c0_0] : memref<1x4xf32, #tpu.memory_space<vmem>>, vector<1x4xf32>
    %c0_1 = arith.constant 0 : index
    %c0_2 = arith.constant 0 : index
    %3 = vector.load %arg7[%c0_1, %c0_2] : memref<1x4xf32, #tpu.memory_space<vmem>>, vector<1x4xf32>
    %c0_3 = arith.constant 0 : index
    %c0_4 = arith.constant 0 : index
    %c0_5 = arith.constant 0 : index
    %4 = vector.load %arg4[%c0_3, %c0_4, %c0_5] : memref<4x8x4xf32, #tpu.memory_space<vmem>>, vector<1x8x4xf32>
    %5 = vector.shape_cast %4 : vector<1x8x4xf32> to vector<8x4xf32>
    %c1 = arith.constant 1 : index
    %c0_6 = arith.constant 0 : index
    %c0_7 = arith.constant 0 : index
    %6 = vector.load %arg4[%c1, %c0_6, %c0_7] : memref<4x8x4xf32, #tpu.memory_space<vmem>>, vector<1x8x4xf32>
    %7 = vector.shape_cast %6 : vector<1x8x4xf32> to vector<8x4xf32>
    %c2 = arith.constant 2 : index
    %c0_8 = arith.constant 0 : index
    %c0_9 = arith.constant 0 : index
    %8 = vector.load %arg4[%c2, %c0_8, %c0_9] : memref<4x8x4xf32, #tpu.memory_space<vmem>>, vector<1x8x4xf32>
    %9 = vector.shape_cast %8 : vector<1x8x4xf32> to vector<8x4xf32>
    %c3 = arith.constant 3 : index
    %c0_10 = arith.constant 0 : index
    %c0_11 = arith.constant 0 : index
    %10 = vector.load %arg4[%c3, %c0_10, %c0_11] : memref<4x8x4xf32, #tpu.memory_space<vmem>>, vector<1x8x4xf32>
    %11 = vector.shape_cast %10 : vector<1x8x4xf32> to vector<8x4xf32>
    %c0_12 = arith.constant 0 : index
    %c0_13 = arith.constant 0 : index
    %c0_14 = arith.constant 0 : index
    %c0_15 = arith.constant 0 : index
    %12 = vector.load %arg6[%c0_12, %c0_13, %c0_14, %c0_15] : memref<3x3x8x4xf32, #tpu.memory_space<vmem>>, vector<1x1x8x4xf32>
    %13 = vector.shape_cast %12 : vector<1x1x8x4xf32> to vector<8x4xf32>
    %c0_16 = arith.constant 0 : index
    %c1_17 = arith.constant 1 : index
    %c0_18 = arith.constant 0 : index
    %c0_19 = arith.constant 0 : index
    %14 = vector.load %arg6[%c0_16, %c1_17, %c0_18, %c0_19] : memref<3x3x8x4xf32, #tpu.memory_space<vmem>>, vector<1x1x8x4xf32>
    %15 = vector.shape_cast %14 : vector<1x1x8x4xf32> to vector<8x4xf32>
    %c0_20 = arith.constant 0 : index
    %c2_21 = arith.constant 2 : index
    %c0_22 = arith.constant 0 : index
    %c0_23 = arith.constant 0 : index
    %16 = vector.load %arg6[%c0_20, %c2_21, %c0_22, %c0_23] : memref<3x3x8x4xf32, #tpu.memory_space<vmem>>, vector<1x1x8x4xf32>
    %17 = vector.shape_cast %16 : vector<1x1x8x4xf32> to vector<8x4xf32>
    %c1_24 = arith.constant 1 : index
    %c0_25 = arith.constant 0 : index
    %c0_26 = arith.constant 0 : index
    %c0_27 = arith.constant 0 : index
    %18 = vector.load %arg6[%c1_24, %c0_25, %c0_26, %c0_27] : memref<3x3x8x4xf32, #tpu.memory_space<vmem>>, vector<1x1x8x4xf32>
    %19 = vector.shape_cast %18 : vector<1x1x8x4xf32> to vector<8x4xf32>
    %c1_28 = arith.constant 1 : index
    %c1_29 = arith.constant 1 : index
    %c0_30 = arith.constant 0 : index
    %c0_31 = arith.constant 0 : index
    %20 = vector.load %arg6[%c1_28, %c1_29, %c0_30, %c0_31] : memref<3x3x8x4xf32, #tpu.memory_space<vmem>>, vector<1x1x8x4xf32>
    %21 = vector.shape_cast %20 : vector<1x1x8x4xf32> to vector<8x4xf32>
    %c1_32 = arith.constant 1 : index
    %c2_33 = arith.constant 2 : index
    %c0_34 = arith.constant 0 : index
    %c0_35 = arith.constant 0 : index
    %22 = vector.load %arg6[%c1_32, %c2_33, %c0_34, %c0_35] : memref<3x3x8x4xf32, #tpu.memory_space<vmem>>, vector<1x1x8x4xf32>
    %23 = vector.shape_cast %22 : vector<1x1x8x4xf32> to vector<8x4xf32>
    %c2_36 = arith.constant 2 : index
    %c0_37 = arith.constant 0 : index
    %c0_38 = arith.constant 0 : index
    %c0_39 = arith.constant 0 : index
    %24 = vector.load %arg6[%c2_36, %c0_37, %c0_38, %c0_39] : memref<3x3x8x4xf32, #tpu.memory_space<vmem>>, vector<1x1x8x4xf32>
    %25 = vector.shape_cast %24 : vector<1x1x8x4xf32> to vector<8x4xf32>
    %c2_40 = arith.constant 2 : index
    %c1_41 = arith.constant 1 : index
    %c0_42 = arith.constant 0 : index
    %c0_43 = arith.constant 0 : index
    %26 = vector.load %arg6[%c2_40, %c1_41, %c0_42, %c0_43] : memref<3x3x8x4xf32, #tpu.memory_space<vmem>>, vector<1x1x8x4xf32>
    %27 = vector.shape_cast %26 : vector<1x1x8x4xf32> to vector<8x4xf32>
    %c2_44 = arith.constant 2 : index
    %c2_45 = arith.constant 2 : index
    %c0_46 = arith.constant 0 : index
    %c0_47 = arith.constant 0 : index
    %28 = vector.load %arg6[%c2_44, %c2_45, %c0_46, %c0_47] : memref<3x3x8x4xf32, #tpu.memory_space<vmem>>, vector<1x1x8x4xf32>
    %29 = vector.shape_cast %28 : vector<1x1x8x4xf32> to vector<8x4xf32>
    %cst = arith.constant 0.000000e+00 : f32
    %30 = vector.broadcast %cst : f32 to vector<4x1x10x8xf32>
    %c0_48 = arith.constant 0 : index
    %c0_49 = arith.constant 0 : index
    %c0_50 = arith.constant 0 : index
    %c0_51 = arith.constant 0 : index
    %31 = vector.load %arg9[%c0_48, %c0_49, %c0_50, %c0_51] : memref<4x4x10x8xf32, #tpu.memory_space<vmem>>, vector<4x1x10x8xf32>
    tpu.vector_store %arg9[%c0_48, %c0_49, %c0_50, %c0_51], %30 {strides = array<i32>} : memref<4x4x10x8xf32, #tpu.memory_space<vmem>>, vector<4x1x10x8xf32>,
    %c0_52 = arith.constant 0 : index
    %c3_53 = arith.constant 3 : index
    %c0_54 = arith.constant 0 : index
    %c0_55 = arith.constant 0 : index
    %32 = vector.load %arg9[%c0_52, %c3_53, %c0_54, %c0_55] : memref<4x4x10x8xf32, #tpu.memory_space<vmem>>, vector<4x1x10x8xf32>
    tpu.vector_store %arg9[%c0_52, %c3_53, %c0_54, %c0_55], %30 {strides = array<i32>} : memref<4x4x10x8xf32, #tpu.memory_space<vmem>>, vector<4x1x10x8xf32>,
    %cst_56 = arith.constant 0.000000e+00 : f32
    %33 = vector.broadcast %cst_56 : f32 to vector<4x4x1x8xf32>
    %c0_57 = arith.constant 0 : index
    %c0_58 = arith.constant 0 : index
    %c0_59 = arith.constant 0 : index
    %c0_60 = arith.constant 0 : index
    %34 = vector.load %arg9[%c0_57, %c0_58, %c0_59, %c0_60] : memref<4x4x10x8xf32, #tpu.memory_space<vmem>>, vector<4x4x1x8xf32>
    tpu.vector_store %arg9[%c0_57, %c0_58, %c0_59, %c0_60], %33 {strides = array<i32>} : memref<4x4x10x8xf32, #tpu.memory_space<vmem>>, vector<4x4x1x8xf32>,
    %c0_61 = arith.constant 0 : index
    %c0_62 = arith.constant 0 : index
    %c9 = arith.constant 9 : index
    %c0_63 = arith.constant 0 : index
    %35 = vector.load %arg9[%c0_61, %c0_62, %c9, %c0_63] : memref<4x4x10x8xf32, #tpu.memory_space<vmem>>, vector<4x4x1x8xf32>
    tpu.vector_store %arg9[%c0_61, %c0_62, %c9, %c0_63], %33 {strides = array<i32>} : memref<4x4x10x8xf32, #tpu.memory_space<vmem>>, vector<4x4x1x8xf32>,
    %c0_64 = arith.constant 0 : index
    %36 = arith.index_cast %1 : i32 to index
    %c0_65 = arith.constant 0 : index
    %c0_66 = arith.constant 0 : index
    %37 = vector.load %arg2[%c0_64, %36, %c0_65, %c0_66] : memref<1x8x8x8xf32, #tpu.memory_space<vmem>>, vector<1x2x8x8xf32>
    %38 = vector.shape_cast %37 : vector<1x2x8x8xf32> to vector<2x8x8xf32>
    %39 = vector.shape_cast %38 : vector<2x8x8xf32> to vector<16x8xf32>
    %c0_67 = arith.constant 0 : index
    %40 = arith.index_cast %1 : i32 to index
    %c0_68 = arith.constant 0 : index
    %c0_69 = arith.constant 0 : index
    %c0_70 = arith.constant 0 : index
    %c0_71 = arith.constant 0 : index
    %41 = vector.load %arg3[%c0_67, %40, %c0_68, %c0_69, %c0_70, %c0_71] : memref<1x8x2x8x2x4xf32, #tpu.memory_space<vmem>>, vector<1x2x1x8x2x4xf32>
    %42 = vector.shape_cast %41 : vector<1x2x1x8x2x4xf32> to vector<2x8x2x4xf32>
    %cst_72 = arith.constant dense<0.000000e+00> : vector<16x4xf32>
    %43 = tpu.matmul %39, %5, %cst_72 {dimension_numbers = #tpu.dot_dimension_numbers<[1], [0], [0], [1], [0, 0, 1, 1], [], []>} : vector<16x8xf32>, vector<8x4xf32>, vector<16x4xf32> -> vector<16x4xf32>
    %44 = vector.broadcast %2 : vector<1x4xf32> to vector<16x4xf32>
    %45 = arith.addf %43, %44 : vector<16x4xf32>
    %46 = vector.shape_cast %45 : vector<16x4xf32> to vector<2x8x4xf32>
    %c0_73 = arith.constant 0 : index
    %c1_74 = arith.constant 1 : index
    %c1_75 = arith.constant 1 : index
    %c0_76 = arith.constant 0 : index
    %47 = vector.load %arg9[%c0_73, %c1_74, %c1_75, %c0_76] : memref<4x4x10x8xf32, #tpu.memory_space<vmem>>, vector<1x2x8x4xf32>
    %48 = vector.shape_cast %47 : vector<1x2x8x4xf32> to vector<2x8x4xf32>
    %49 = vector.shape_cast %46 : vector<2x8x4xf32> to vector<1x2x8x4xf32>
    tpu.vector_store %arg9[%c0_73, %c1_74, %c1_75, %c0_76], %49 {strides = array<i32>} : memref<4x4x10x8xf32, #tpu.memory_space<vmem>>, vector<1x2x8x4xf32>,
    %50 = vector.extract_strided_slice %42 {offsets = [0, 0, 0, 0], sizes = [2, 8, 1, 4], strides = [1, 1, 1, 1]} : vector<2x8x2x4xf32> to vector<2x8x1x4xf32>
    %51 = vector.shape_cast %50 : vector<2x8x1x4xf32> to vector<2x8x4xf32>
    %c0_77 = arith.constant 0 : index
    %c1_78 = arith.constant 1 : index
    %c1_79 = arith.constant 1 : index
    %c4 = arith.constant 4 : index
    %52 = vector.load %arg9[%c0_77, %c1_78, %c1_79, %c4] : memref<4x4x10x8xf32, #tpu.memory_space<vmem>>, vector<1x2x8x4xf32>
    %53 = vector.shape_cast %52 : vector<1x2x8x4xf32> to vector<2x8x4xf32>
    %54 = vector.shape_cast %51 : vector<2x8x4xf32> to vector<1x2x8x4xf32>
    tpu.vector_store %arg9[%c0_77, %c1_78, %c1_79, %c4], %54 {strides = array<i32>} : memref<4x4x10x8xf32, #tpu.memory_space<vmem>>, vector<1x2x8x4xf32>,
    %cst_80 = arith.constant dense<0.000000e+00> : vector<16x4xf32>
    %55 = tpu.matmul %39, %7, %cst_80 {dimension_numbers = #tpu.dot_dimension_numbers<[1], [0], [0], [1], [0, 0, 1, 1], [], []>} : vector<16x8xf32>, vector<8x4xf32>, vector<16x4xf32> -> vector<16x4xf32>
    %56 = vector.broadcast %2 : vector<1x4xf32> to vector<16x4xf32>
    %57 = arith.addf %55, %56 : vector<16x4xf32>
    %58 = vector.shape_cast %57 : vector<16x4xf32> to vector<2x8x4xf32>
    %c1_81 = arith.constant 1 : index
    %c1_82 = arith.constant 1 : index
    %c1_83 = arith.constant 1 : index
    %c0_84 = arith.constant 0 : index
    %59 = vector.load %arg9[%c1_81, %c1_82, %c1_83, %c0_84] : memref<4x4x10x8xf32, #tpu.memory_space<vmem>>, vector<1x2x8x4xf32>
    %60 = vector.shape_cast %59 : vector<1x2x8x4xf32> to vector<2x8x4xf32>
    %61 = vector.shape_cast %58 : vector<2x8x4xf32> to vector<1x2x8x4xf32>
    tpu.vector_store %arg9[%c1_81, %c1_82, %c1_83, %c0_84], %61 {strides = array<i32>} : memref<4x4x10x8xf32, #tpu.memory_space<vmem>>, vector<1x2x8x4xf32>,
    %62 = vector.extract_strided_slice %42 {offsets = [0, 0, 1, 0], sizes = [2, 8, 1, 4], strides = [1, 1, 1, 1]} : vector<2x8x2x4xf32> to vector<2x8x1x4xf32>
    %63 = vector.shape_cast %62 : vector<2x8x1x4xf32> to vector<2x8x4xf32>
    %c1_85 = arith.constant 1 : index
    %c1_86 = arith.constant 1 : index
    %c1_87 = arith.constant 1 : index
    %c4_88 = arith.constant 4 : index
    %64 = vector.load %arg9[%c1_85, %c1_86, %c1_87, %c4_88] : memref<4x4x10x8xf32, #tpu.memory_space<vmem>>, vector<1x2x8x4xf32>
    %65 = vector.shape_cast %64 : vector<1x2x8x4xf32> to vector<2x8x4xf32>
    %66 = vector.shape_cast %63 : vector<2x8x4xf32> to vector<1x2x8x4xf32>
    tpu.vector_store %arg9[%c1_85, %c1_86, %c1_87, %c4_88], %66 {strides = array<i32>} : memref<4x4x10x8xf32, #tpu.memory_space<vmem>>, vector<1x2x8x4xf32>,
    %c0_89 = arith.constant 0 : index
    %67 = arith.index_cast %1 : i32 to index
    %c1_90 = arith.constant 1 : index
    %c0_91 = arith.constant 0 : index
    %c0_92 = arith.constant 0 : index
    %c0_93 = arith.constant 0 : index
    %68 = vector.load %arg3[%c0_89, %67, %c1_90, %c0_91, %c0_92, %c0_93] : memref<1x8x2x8x2x4xf32, #tpu.memory_space<vmem>>, vector<1x2x1x8x2x4xf32>
    %69 = vector.shape_cast %68 : vector<1x2x1x8x2x4xf32> to vector<2x8x2x4xf32>
    %cst_94 = arith.constant dense<0.000000e+00> : vector<16x4xf32>
    %70 = tpu.matmul %39, %9, %cst_94 {dimension_numbers = #tpu.dot_dimension_numbers<[1], [0], [0], [1], [0, 0, 1, 1], [], []>} : vector<16x8xf32>, vector<8x4xf32>, vector<16x4xf32> -> vector<16x4xf32>
    %71 = vector.broadcast %2 : vector<1x4xf32> to vector<16x4xf32>
    %72 = arith.addf %70, %71 : vector<16x4xf32>
    %73 = vector.shape_cast %72 : vector<16x4xf32> to vector<2x8x4xf32>
    %c2_95 = arith.constant 2 : index
    %c1_96 = arith.constant 1 : index
    %c1_97 = arith.constant 1 : index
    %c0_98 = arith.constant 0 : index
    %74 = vector.load %arg9[%c2_95, %c1_96, %c1_97, %c0_98] : memref<4x4x10x8xf32, #tpu.memory_space<vmem>>, vector<1x2x8x4xf32>
    %75 = vector.shape_cast %74 : vector<1x2x8x4xf32> to vector<2x8x4xf32>
    %76 = vector.shape_cast %73 : vector<2x8x4xf32> to vector<1x2x8x4xf32>
    tpu.vector_store %arg9[%c2_95, %c1_96, %c1_97, %c0_98], %76 {strides = array<i32>} : memref<4x4x10x8xf32, #tpu.memory_space<vmem>>, vector<1x2x8x4xf32>,
    %77 = vector.extract_strided_slice %69 {offsets = [0, 0, 0, 0], sizes = [2, 8, 1, 4], strides = [1, 1, 1, 1]} : vector<2x8x2x4xf32> to vector<2x8x1x4xf32>
    %78 = vector.shape_cast %77 : vector<2x8x1x4xf32> to vector<2x8x4xf32>
    %c2_99 = arith.constant 2 : index
    %c1_100 = arith.constant 1 : index
    %c1_101 = arith.constant 1 : index
    %c4_102 = arith.constant 4 : index
    %79 = vector.load %arg9[%c2_99, %c1_100, %c1_101, %c4_102] : memref<4x4x10x8xf32, #tpu.memory_space<vmem>>, vector<1x2x8x4xf32>
    %80 = vector.shape_cast %79 : vector<1x2x8x4xf32> to vector<2x8x4xf32>
    %81 = vector.shape_cast %78 : vector<2x8x4xf32> to vector<1x2x8x4xf32>
    tpu.vector_store %arg9[%c2_99, %c1_100, %c1_101, %c4_102], %81 {strides = array<i32>} : memref<4x4x10x8xf32, #tpu.memory_space<vmem>>, vector<1x2x8x4xf32>,
    %cst_103 = arith.constant dense<0.000000e+00> : vector<16x4xf32>
    %82 = tpu.matmul %39, %11, %cst_103 {dimension_numbers = #tpu.dot_dimension_numbers<[1], [0], [0], [1], [0, 0, 1, 1], [], []>} : vector<16x8xf32>, vector<8x4xf32>, vector<16x4xf32> -> vector<16x4xf32>
    %83 = vector.broadcast %2 : vector<1x4xf32> to vector<16x4xf32>
    %84 = arith.addf %82, %83 : vector<16x4xf32>
    %85 = vector.shape_cast %84 : vector<16x4xf32> to vector<2x8x4xf32>
    %c3_104 = arith.constant 3 : index
    %c1_105 = arith.constant 1 : index
    %c1_106 = arith.constant 1 : index
    %c0_107 = arith.constant 0 : index
    %86 = vector.load %arg9[%c3_104, %c1_105, %c1_106, %c0_107] : memref<4x4x10x8xf32, #tpu.memory_space<vmem>>, vector<1x2x8x4xf32>
    %87 = vector.shape_cast %86 : vector<1x2x8x4xf32> to vector<2x8x4xf32>
    %88 = vector.shape_cast %85 : vector<2x8x4xf32> to vector<1x2x8x4xf32>
    tpu.vector_store %arg9[%c3_104, %c1_105, %c1_106, %c0_107], %88 {strides = array<i32>} : memref<4x4x10x8xf32, #tpu.memory_space<vmem>>, vector<1x2x8x4xf32>,
    %89 = vector.extract_strided_slice %69 {offsets = [0, 0, 1, 0], sizes = [2, 8, 1, 4], strides = [1, 1, 1, 1]} : vector<2x8x2x4xf32> to vector<2x8x1x4xf32>
    %90 = vector.shape_cast %89 : vector<2x8x1x4xf32> to vector<2x8x4xf32>
    %c3_108 = arith.constant 3 : index
    %c1_109 = arith.constant 1 : index
    %c1_110 = arith.constant 1 : index
    %c4_111 = arith.constant 4 : index
    %91 = vector.load %arg9[%c3_108, %c1_109, %c1_110, %c4_111] : memref<4x4x10x8xf32, #tpu.memory_space<vmem>>, vector<1x2x8x4xf32>
    %92 = vector.shape_cast %91 : vector<1x2x8x4xf32> to vector<2x8x4xf32>
    %93 = vector.shape_cast %90 : vector<2x8x4xf32> to vector<1x2x8x4xf32>
    tpu.vector_store %arg9[%c3_108, %c1_109, %c1_110, %c4_111], %93 {strides = array<i32>} : memref<4x4x10x8xf32, #tpu.memory_space<vmem>>, vector<1x2x8x4xf32>,
    %c0_i32 = arith.constant 0 : i32
    %94 = arith.cmpi sgt, %arg1, %c0_i32 : i32
    %95 = arith.extui %94 : i1 to i32
    %c0_i32_112 = arith.constant 0 : i32
    %96 = arith.cmpi ne, %95, %c0_i32_112 : i32
    scf.if %96 {
      %c1_i32 = arith.constant 1 : i32
      %316 = arith.subi %1, %c1_i32 : i32
      %c0_314 = arith.constant 0 : index
      %317 = arith.index_cast %316 : i32 to index
      %c0_315 = arith.constant 0 : index
      %c0_316 = arith.constant 0 : index
      %318 = vector.load %arg2[%c0_314, %317, %c0_315, %c0_316] : memref<1x8x8x8xf32, #tpu.memory_space<vmem>>, vector<1x1x8x8xf32>
      %319 = vector.shape_cast %318 : vector<1x1x8x8xf32> to vector<1x8x8xf32>
      %320 = vector.shape_cast %319 : vector<1x8x8xf32> to vector<8x8xf32>
      %c0_317 = arith.constant 0 : index
      %321 = arith.index_cast %316 : i32 to index
      %c0_318 = arith.constant 0 : index
      %c0_319 = arith.constant 0 : index
      %c0_320 = arith.constant 0 : index
      %c0_321 = arith.constant 0 : index
      %322 = vector.load %arg3[%c0_317, %321, %c0_318, %c0_319, %c0_320, %c0_321] : memref<1x8x2x8x2x4xf32, #tpu.memory_space<vmem>>, vector<1x1x1x8x2x4xf32>
      %323 = vector.shape_cast %322 : vector<1x1x1x8x2x4xf32> to vector<1x8x2x4xf32>
      %cst_322 = arith.constant dense<0.000000e+00> : vector<8x4xf32>
      %324 = tpu.matmul %320, %5, %cst_322 {dimension_numbers = #tpu.dot_dimension_numbers<[1], [0], [0], [1], [0, 0, 1, 1], [], []>} : vector<8x8xf32>, vector<8x4xf32>, vector<8x4xf32> -> vector<8x4xf32>
      %325 = vector.broadcast %2 : vector<1x4xf32> to vector<8x4xf32>
      %326 = arith.addf %324, %325 : vector<8x4xf32>
      %327 = vector.shape_cast %326 : vector<8x4xf32> to vector<1x8x4xf32>
      %c0_323 = arith.constant 0 : index
      %c0_324 = arith.constant 0 : index
      %c1_325 = arith.constant 1 : index
      %c0_326 = arith.constant 0 : index
      %328 = vector.load %arg9[%c0_323, %c0_324, %c1_325, %c0_326] : memref<4x4x10x8xf32, #tpu.memory_space<vmem>>, vector<1x1x8x4xf32>
      %329 = vector.shape_cast %328 : vector<1x1x8x4xf32> to vector<1x8x4xf32>
      %330 = vector.shape_cast %327 : vector<1x8x4xf32> to vector<1x1x8x4xf32>
      tpu.vector_store %arg9[%c0_323, %c0_324, %c1_325, %c0_326], %330 {strides = array<i32>} : memref<4x4x10x8xf32, #tpu.memory_space<vmem>>, vector<1x1x8x4xf32>,
      %331 = vector.extract_strided_slice %323 {offsets = [0, 0, 0, 0], sizes = [1, 8, 1, 4], strides = [1, 1, 1, 1]} : vector<1x8x2x4xf32> to vector<1x8x1x4xf32>
      %332 = vector.shape_cast %331 : vector<1x8x1x4xf32> to vector<1x8x4xf32>
      %c0_327 = arith.constant 0 : index
      %c0_328 = arith.constant 0 : index
      %c1_329 = arith.constant 1 : index
      %c4_330 = arith.constant 4 : index
      %333 = vector.load %arg9[%c0_327, %c0_328, %c1_329, %c4_330] : memref<4x4x10x8xf32, #tpu.memory_space<vmem>>, vector<1x1x8x4xf32>
      %334 = vector.shape_cast %333 : vector<1x1x8x4xf32> to vector<1x8x4xf32>
      %335 = vector.shape_cast %332 : vector<1x8x4xf32> to vector<1x1x8x4xf32>
      tpu.vector_store %arg9[%c0_327, %c0_328, %c1_329, %c4_330], %335 {strides = array<i32>} : memref<4x4x10x8xf32, #tpu.memory_space<vmem>>, vector<1x1x8x4xf32>,
      %cst_331 = arith.constant dense<0.000000e+00> : vector<8x4xf32>
      %336 = tpu.matmul %320, %7, %cst_331 {dimension_numbers = #tpu.dot_dimension_numbers<[1], [0], [0], [1], [0, 0, 1, 1], [], []>} : vector<8x8xf32>, vector<8x4xf32>, vector<8x4xf32> -> vector<8x4xf32>
      %337 = vector.broadcast %2 : vector<1x4xf32> to vector<8x4xf32>
      %338 = arith.addf %336, %337 : vector<8x4xf32>
      %339 = vector.shape_cast %338 : vector<8x4xf32> to vector<1x8x4xf32>
      %c1_332 = arith.constant 1 : index
      %c0_333 = arith.constant 0 : index
      %c1_334 = arith.constant 1 : index
      %c0_335 = arith.constant 0 : index
      %340 = vector.load %arg9[%c1_332, %c0_333, %c1_334, %c0_335] : memref<4x4x10x8xf32, #tpu.memory_space<vmem>>, vector<1x1x8x4xf32>
      %341 = vector.shape_cast %340 : vector<1x1x8x4xf32> to vector<1x8x4xf32>
      %342 = vector.shape_cast %339 : vector<1x8x4xf32> to vector<1x1x8x4xf32>
      tpu.vector_store %arg9[%c1_332, %c0_333, %c1_334, %c0_335], %342 {strides = array<i32>} : memref<4x4x10x8xf32, #tpu.memory_space<vmem>>, vector<1x1x8x4xf32>,
      %343 = vector.extract_strided_slice %323 {offsets = [0, 0, 1, 0], sizes = [1, 8, 1, 4], strides = [1, 1, 1, 1]} : vector<1x8x2x4xf32> to vector<1x8x1x4xf32>
      %344 = vector.shape_cast %343 : vector<1x8x1x4xf32> to vector<1x8x4xf32>
      %c1_336 = arith.constant 1 : index
      %c0_337 = arith.constant 0 : index
      %c1_338 = arith.constant 1 : index
      %c4_339 = arith.constant 4 : index
      %345 = vector.load %arg9[%c1_336, %c0_337, %c1_338, %c4_339] : memref<4x4x10x8xf32, #tpu.memory_space<vmem>>, vector<1x1x8x4xf32>
      %346 = vector.shape_cast %345 : vector<1x1x8x4xf32> to vector<1x8x4xf32>
      %347 = vector.shape_cast %344 : vector<1x8x4xf32> to vector<1x1x8x4xf32>
      tpu.vector_store %arg9[%c1_336, %c0_337, %c1_338, %c4_339], %347 {strides = array<i32>} : memref<4x4x10x8xf32, #tpu.memory_space<vmem>>, vector<1x1x8x4xf32>,
      %c0_340 = arith.constant 0 : index
      %348 = arith.index_cast %316 : i32 to index
      %c1_341 = arith.constant 1 : index
      %c0_342 = arith.constant 0 : index
      %c0_343 = arith.constant 0 : index
      %c0_344 = arith.constant 0 : index
      %349 = vector.load %arg3[%c0_340, %348, %c1_341, %c0_342, %c0_343, %c0_344] : memref<1x8x2x8x2x4xf32, #tpu.memory_space<vmem>>, vector<1x1x1x8x2x4xf32>
      %350 = vector.shape_cast %349 : vector<1x1x1x8x2x4xf32> to vector<1x8x2x4xf32>
      %cst_345 = arith.constant dense<0.000000e+00> : vector<8x4xf32>
      %351 = tpu.matmul %320, %9, %cst_345 {dimension_numbers = #tpu.dot_dimension_numbers<[1], [0], [0], [1], [0, 0, 1, 1], [], []>} : vector<8x8xf32>, vector<8x4xf32>, vector<8x4xf32> -> vector<8x4xf32>
      %352 = vector.broadcast %2 : vector<1x4xf32> to vector<8x4xf32>
      %353 = arith.addf %351, %352 : vector<8x4xf32>
      %354 = vector.shape_cast %353 : vector<8x4xf32> to vector<1x8x4xf32>
      %c2_346 = arith.constant 2 : index
      %c0_347 = arith.constant 0 : index
      %c1_348 = arith.constant 1 : index
      %c0_349 = arith.constant 0 : index
      %355 = vector.load %arg9[%c2_346, %c0_347, %c1_348, %c0_349] : memref<4x4x10x8xf32, #tpu.memory_space<vmem>>, vector<1x1x8x4xf32>
      %356 = vector.shape_cast %355 : vector<1x1x8x4xf32> to vector<1x8x4xf32>
      %357 = vector.shape_cast %354 : vector<1x8x4xf32> to vector<1x1x8x4xf32>
      tpu.vector_store %arg9[%c2_346, %c0_347, %c1_348, %c0_349], %357 {strides = array<i32>} : memref<4x4x10x8xf32, #tpu.memory_space<vmem>>, vector<1x1x8x4xf32>,
      %358 = vector.extract_strided_slice %350 {offsets = [0, 0, 0, 0], sizes = [1, 8, 1, 4], strides = [1, 1, 1, 1]} : vector<1x8x2x4xf32> to vector<1x8x1x4xf32>
      %359 = vector.shape_cast %358 : vector<1x8x1x4xf32> to vector<1x8x4xf32>
      %c2_350 = arith.constant 2 : index
      %c0_351 = arith.constant 0 : index
      %c1_352 = arith.constant 1 : index
      %c4_353 = arith.constant 4 : index
      %360 = vector.load %arg9[%c2_350, %c0_351, %c1_352, %c4_353] : memref<4x4x10x8xf32, #tpu.memory_space<vmem>>, vector<1x1x8x4xf32>
      %361 = vector.shape_cast %360 : vector<1x1x8x4xf32> to vector<1x8x4xf32>
      %362 = vector.shape_cast %359 : vector<1x8x4xf32> to vector<1x1x8x4xf32>
      tpu.vector_store %arg9[%c2_350, %c0_351, %c1_352, %c4_353], %362 {strides = array<i32>} : memref<4x4x10x8xf32, #tpu.memory_space<vmem>>, vector<1x1x8x4xf32>,
      %cst_354 = arith.constant dense<0.000000e+00> : vector<8x4xf32>
      %363 = tpu.matmul %320, %11, %cst_354 {dimension_numbers = #tpu.dot_dimension_numbers<[1], [0], [0], [1], [0, 0, 1, 1], [], []>} : vector<8x8xf32>, vector<8x4xf32>, vector<8x4xf32> -> vector<8x4xf32>
      %364 = vector.broadcast %2 : vector<1x4xf32> to vector<8x4xf32>
      %365 = arith.addf %363, %364 : vector<8x4xf32>
      %366 = vector.shape_cast %365 : vector<8x4xf32> to vector<1x8x4xf32>
      %c3_355 = arith.constant 3 : index
      %c0_356 = arith.constant 0 : index
      %c1_357 = arith.constant 1 : index
      %c0_358 = arith.constant 0 : index
      %367 = vector.load %arg9[%c3_355, %c0_356, %c1_357, %c0_358] : memref<4x4x10x8xf32, #tpu.memory_space<vmem>>, vector<1x1x8x4xf32>
      %368 = vector.shape_cast %367 : vector<1x1x8x4xf32> to vector<1x8x4xf32>
      %369 = vector.shape_cast %366 : vector<1x8x4xf32> to vector<1x1x8x4xf32>
      tpu.vector_store %arg9[%c3_355, %c0_356, %c1_357, %c0_358], %369 {strides = array<i32>} : memref<4x4x10x8xf32, #tpu.memory_space<vmem>>, vector<1x1x8x4xf32>,
      %370 = vector.extract_strided_slice %350 {offsets = [0, 0, 1, 0], sizes = [1, 8, 1, 4], strides = [1, 1, 1, 1]} : vector<1x8x2x4xf32> to vector<1x8x1x4xf32>
      %371 = vector.shape_cast %370 : vector<1x8x1x4xf32> to vector<1x8x4xf32>
      %c3_359 = arith.constant 3 : index
      %c0_360 = arith.constant 0 : index
      %c1_361 = arith.constant 1 : index
      %c4_362 = arith.constant 4 : index
      %372 = vector.load %arg9[%c3_359, %c0_360, %c1_361, %c4_362] : memref<4x4x10x8xf32, #tpu.memory_space<vmem>>, vector<1x1x8x4xf32>
      %373 = vector.shape_cast %372 : vector<1x1x8x4xf32> to vector<1x8x4xf32>
      %374 = vector.shape_cast %371 : vector<1x8x4xf32> to vector<1x1x8x4xf32>
      tpu.vector_store %arg9[%c3_359, %c0_360, %c1_361, %c4_362], %374 {strides = array<i32>} : memref<4x4x10x8xf32, #tpu.memory_space<vmem>>, vector<1x1x8x4xf32>,
    } else {
    }
    %c3_i32 = arith.constant 3 : i32
    %97 = arith.cmpi slt, %arg1, %c3_i32 : i32
    %98 = arith.extui %97 : i1 to i32
    %c0_i32_113 = arith.constant 0 : i32
    %99 = arith.cmpi ne, %98, %c0_i32_113 : i32
    scf.if %99 {
      %c2_i32_314 = arith.constant 2 : i32
      %316 = arith.addi %1, %c2_i32_314 : i32
      %c0_315 = arith.constant 0 : index
      %317 = arith.index_cast %316 : i32 to index
      %c0_316 = arith.constant 0 : index
      %c0_317 = arith.constant 0 : index
      %318 = vector.load %arg2[%c0_315, %317, %c0_316, %c0_317] : memref<1x8x8x8xf32, #tpu.memory_space<vmem>>, vector<1x1x8x8xf32>
      %319 = vector.shape_cast %318 : vector<1x1x8x8xf32> to vector<1x8x8xf32>
      %320 = vector.shape_cast %319 : vector<1x8x8xf32> to vector<8x8xf32>
      %c0_318 = arith.constant 0 : index
      %321 = arith.index_cast %316 : i32 to index
      %c0_319 = arith.constant 0 : index
      %c0_320 = arith.constant 0 : index
      %c0_321 = arith.constant 0 : index
      %c0_322 = arith.constant 0 : index
      %322 = vector.load %arg3[%c0_318, %321, %c0_319, %c0_320, %c0_321, %c0_322] : memref<1x8x2x8x2x4xf32, #tpu.memory_space<vmem>>, vector<1x1x1x8x2x4xf32>
      %323 = vector.shape_cast %322 : vector<1x1x1x8x2x4xf32> to vector<1x8x2x4xf32>
      %cst_323 = arith.constant dense<0.000000e+00> : vector<8x4xf32>
      %324 = tpu.matmul %320, %5, %cst_323 {dimension_numbers = #tpu.dot_dimension_numbers<[1], [0], [0], [1], [0, 0, 1, 1], [], []>} : vector<8x8xf32>, vector<8x4xf32>, vector<8x4xf32> -> vector<8x4xf32>
      %325 = vector.broadcast %2 : vector<1x4xf32> to vector<8x4xf32>
      %326 = arith.addf %324, %325 : vector<8x4xf32>
      %327 = vector.shape_cast %326 : vector<8x4xf32> to vector<1x8x4xf32>
      %c0_324 = arith.constant 0 : index
      %c3_325 = arith.constant 3 : index
      %c1_326 = arith.constant 1 : index
      %c0_327 = arith.constant 0 : index
      %328 = vector.load %arg9[%c0_324, %c3_325, %c1_326, %c0_327] : memref<4x4x10x8xf32, #tpu.memory_space<vmem>>, vector<1x1x8x4xf32>
      %329 = vector.shape_cast %328 : vector<1x1x8x4xf32> to vector<1x8x4xf32>
      %330 = vector.shape_cast %327 : vector<1x8x4xf32> to vector<1x1x8x4xf32>
      tpu.vector_store %arg9[%c0_324, %c3_325, %c1_326, %c0_327], %330 {strides = array<i32>} : memref<4x4x10x8xf32, #tpu.memory_space<vmem>>, vector<1x1x8x4xf32>,
      %331 = vector.extract_strided_slice %323 {offsets = [0, 0, 0, 0], sizes = [1, 8, 1, 4], strides = [1, 1, 1, 1]} : vector<1x8x2x4xf32> to vector<1x8x1x4xf32>
      %332 = vector.shape_cast %331 : vector<1x8x1x4xf32> to vector<1x8x4xf32>
      %c0_328 = arith.constant 0 : index
      %c3_329 = arith.constant 3 : index
      %c1_330 = arith.constant 1 : index
      %c4_331 = arith.constant 4 : index
      %333 = vector.load %arg9[%c0_328, %c3_329, %c1_330, %c4_331] : memref<4x4x10x8xf32, #tpu.memory_space<vmem>>, vector<1x1x8x4xf32>
      %334 = vector.shape_cast %333 : vector<1x1x8x4xf32> to vector<1x8x4xf32>
      %335 = vector.shape_cast %332 : vector<1x8x4xf32> to vector<1x1x8x4xf32>
      tpu.vector_store %arg9[%c0_328, %c3_329, %c1_330, %c4_331], %335 {strides = array<i32>} : memref<4x4x10x8xf32, #tpu.memory_space<vmem>>, vector<1x1x8x4xf32>,
      %cst_332 = arith.constant dense<0.000000e+00> : vector<8x4xf32>
      %336 = tpu.matmul %320, %7, %cst_332 {dimension_numbers = #tpu.dot_dimension_numbers<[1], [0], [0], [1], [0, 0, 1, 1], [], []>} : vector<8x8xf32>, vector<8x4xf32>, vector<8x4xf32> -> vector<8x4xf32>
      %337 = vector.broadcast %2 : vector<1x4xf32> to vector<8x4xf32>
      %338 = arith.addf %336, %337 : vector<8x4xf32>
      %339 = vector.shape_cast %338 : vector<8x4xf32> to vector<1x8x4xf32>
      %c1_333 = arith.constant 1 : index
      %c3_334 = arith.constant 3 : index
      %c1_335 = arith.constant 1 : index
      %c0_336 = arith.constant 0 : index
      %340 = vector.load %arg9[%c1_333, %c3_334, %c1_335, %c0_336] : memref<4x4x10x8xf32, #tpu.memory_space<vmem>>, vector<1x1x8x4xf32>
      %341 = vector.shape_cast %340 : vector<1x1x8x4xf32> to vector<1x8x4xf32>
      %342 = vector.shape_cast %339 : vector<1x8x4xf32> to vector<1x1x8x4xf32>
      tpu.vector_store %arg9[%c1_333, %c3_334, %c1_335, %c0_336], %342 {strides = array<i32>} : memref<4x4x10x8xf32, #tpu.memory_space<vmem>>, vector<1x1x8x4xf32>,
      %343 = vector.extract_strided_slice %323 {offsets = [0, 0, 1, 0], sizes = [1, 8, 1, 4], strides = [1, 1, 1, 1]} : vector<1x8x2x4xf32> to vector<1x8x1x4xf32>
      %344 = vector.shape_cast %343 : vector<1x8x1x4xf32> to vector<1x8x4xf32>
      %c1_337 = arith.constant 1 : index
      %c3_338 = arith.constant 3 : index
      %c1_339 = arith.constant 1 : index
      %c4_340 = arith.constant 4 : index
      %345 = vector.load %arg9[%c1_337, %c3_338, %c1_339, %c4_340] : memref<4x4x10x8xf32, #tpu.memory_space<vmem>>, vector<1x1x8x4xf32>
      %346 = vector.shape_cast %345 : vector<1x1x8x4xf32> to vector<1x8x4xf32>
      %347 = vector.shape_cast %344 : vector<1x8x4xf32> to vector<1x1x8x4xf32>
      tpu.vector_store %arg9[%c1_337, %c3_338, %c1_339, %c4_340], %347 {strides = array<i32>} : memref<4x4x10x8xf32, #tpu.memory_space<vmem>>, vector<1x1x8x4xf32>,
      %c0_341 = arith.constant 0 : index
      %348 = arith.index_cast %316 : i32 to index
      %c1_342 = arith.constant 1 : index
      %c0_343 = arith.constant 0 : index
      %c0_344 = arith.constant 0 : index
      %c0_345 = arith.constant 0 : index
      %349 = vector.load %arg3[%c0_341, %348, %c1_342, %c0_343, %c0_344, %c0_345] : memref<1x8x2x8x2x4xf32, #tpu.memory_space<vmem>>, vector<1x1x1x8x2x4xf32>
      %350 = vector.shape_cast %349 : vector<1x1x1x8x2x4xf32> to vector<1x8x2x4xf32>
      %cst_346 = arith.constant dense<0.000000e+00> : vector<8x4xf32>
      %351 = tpu.matmul %320, %9, %cst_346 {dimension_numbers = #tpu.dot_dimension_numbers<[1], [0], [0], [1], [0, 0, 1, 1], [], []>} : vector<8x8xf32>, vector<8x4xf32>, vector<8x4xf32> -> vector<8x4xf32>
      %352 = vector.broadcast %2 : vector<1x4xf32> to vector<8x4xf32>
      %353 = arith.addf %351, %352 : vector<8x4xf32>
      %354 = vector.shape_cast %353 : vector<8x4xf32> to vector<1x8x4xf32>
      %c2_347 = arith.constant 2 : index
      %c3_348 = arith.constant 3 : index
      %c1_349 = arith.constant 1 : index
      %c0_350 = arith.constant 0 : index
      %355 = vector.load %arg9[%c2_347, %c3_348, %c1_349, %c0_350] : memref<4x4x10x8xf32, #tpu.memory_space<vmem>>, vector<1x1x8x4xf32>
      %356 = vector.shape_cast %355 : vector<1x1x8x4xf32> to vector<1x8x4xf32>
      %357 = vector.shape_cast %354 : vector<1x8x4xf32> to vector<1x1x8x4xf32>
      tpu.vector_store %arg9[%c2_347, %c3_348, %c1_349, %c0_350], %357 {strides = array<i32>} : memref<4x4x10x8xf32, #tpu.memory_space<vmem>>, vector<1x1x8x4xf32>,
      %358 = vector.extract_strided_slice %350 {offsets = [0, 0, 0, 0], sizes = [1, 8, 1, 4], strides = [1, 1, 1, 1]} : vector<1x8x2x4xf32> to vector<1x8x1x4xf32>
      %359 = vector.shape_cast %358 : vector<1x8x1x4xf32> to vector<1x8x4xf32>
      %c2_351 = arith.constant 2 : index
      %c3_352 = arith.constant 3 : index
      %c1_353 = arith.constant 1 : index
      %c4_354 = arith.constant 4 : index
      %360 = vector.load %arg9[%c2_351, %c3_352, %c1_353, %c4_354] : memref<4x4x10x8xf32, #tpu.memory_space<vmem>>, vector<1x1x8x4xf32>
      %361 = vector.shape_cast %360 : vector<1x1x8x4xf32> to vector<1x8x4xf32>
      %362 = vector.shape_cast %359 : vector<1x8x4xf32> to vector<1x1x8x4xf32>
      tpu.vector_store %arg9[%c2_351, %c3_352, %c1_353, %c4_354], %362 {strides = array<i32>} : memref<4x4x10x8xf32, #tpu.memory_space<vmem>>, vector<1x1x8x4xf32>,
      %cst_355 = arith.constant dense<0.000000e+00> : vector<8x4xf32>
      %363 = tpu.matmul %320, %11, %cst_355 {dimension_numbers = #tpu.dot_dimension_numbers<[1], [0], [0], [1], [0, 0, 1, 1], [], []>} : vector<8x8xf32>, vector<8x4xf32>, vector<8x4xf32> -> vector<8x4xf32>
      %364 = vector.broadcast %2 : vector<1x4xf32> to vector<8x4xf32>
      %365 = arith.addf %363, %364 : vector<8x4xf32>
      %366 = vector.shape_cast %365 : vector<8x4xf32> to vector<1x8x4xf32>
      %c3_356 = arith.constant 3 : index
      %c3_357 = arith.constant 3 : index
      %c1_358 = arith.constant 1 : index
      %c0_359 = arith.constant 0 : index
      %367 = vector.load %arg9[%c3_356, %c3_357, %c1_358, %c0_359] : memref<4x4x10x8xf32, #tpu.memory_space<vmem>>, vector<1x1x8x4xf32>
      %368 = vector.shape_cast %367 : vector<1x1x8x4xf32> to vector<1x8x4xf32>
      %369 = vector.shape_cast %366 : vector<1x8x4xf32> to vector<1x1x8x4xf32>
      tpu.vector_store %arg9[%c3_356, %c3_357, %c1_358, %c0_359], %369 {strides = array<i32>} : memref<4x4x10x8xf32, #tpu.memory_space<vmem>>, vector<1x1x8x4xf32>,
      %370 = vector.extract_strided_slice %350 {offsets = [0, 0, 1, 0], sizes = [1, 8, 1, 4], strides = [1, 1, 1, 1]} : vector<1x8x2x4xf32> to vector<1x8x1x4xf32>
      %371 = vector.shape_cast %370 : vector<1x8x1x4xf32> to vector<1x8x4xf32>
      %c3_360 = arith.constant 3 : index
      %c3_361 = arith.constant 3 : index
      %c1_362 = arith.constant 1 : index
      %c4_363 = arith.constant 4 : index
      %372 = vector.load %arg9[%c3_360, %c3_361, %c1_362, %c4_363] : memref<4x4x10x8xf32, #tpu.memory_space<vmem>>, vector<1x1x8x4xf32>
      %373 = vector.shape_cast %372 : vector<1x1x8x4xf32> to vector<1x8x4xf32>
      %374 = vector.shape_cast %371 : vector<1x8x4xf32> to vector<1x1x8x4xf32>
      tpu.vector_store %arg9[%c3_360, %c3_361, %c1_362, %c4_363], %374 {strides = array<i32>} : memref<4x4x10x8xf32, #tpu.memory_space<vmem>>, vector<1x1x8x4xf32>,
    } else {
    }
    %cst_114 = arith.constant 0.000000e+00 : f32
    %100 = vector.broadcast %cst_114 : f32 to vector<16x4xf32>
    %c3_115 = arith.constant 3 : index
    %c0_116 = arith.constant 0 : index
    %c0_117 = arith.constant 0 : index
    %c0_118 = arith.constant 0 : index
    %101 = vector.load %arg9[%c3_115, %c0_116, %c0_117, %c0_118] : memref<4x4x10x8xf32, #tpu.memory_space<vmem>>, vector<1x2x8x8xf32>
    %102 = vector.shape_cast %101 : vector<1x2x8x8xf32> to vector<2x8x8xf32>
    %103 = vector.shape_cast %102 : vector<2x8x8xf32> to vector<16x8xf32>
    %cst_119 = arith.constant dense<0.000000e+00> : vector<16x4xf32>
    %104 = tpu.matmul %103, %13, %cst_119 {dimension_numbers = #tpu.dot_dimension_numbers<[1], [0], [0], [1], [0, 0, 1, 1], [], []>} : vector<16x8xf32>, vector<8x4xf32>, vector<16x4xf32> -> vector<16x4xf32>
    %105 = arith.addf %100, %104 : vector<16x4xf32>
    %c2_120 = arith.constant 2 : index
    %c0_121 = arith.constant 0 : index
    %c1_122 = arith.constant 1 : index
    %c0_123 = arith.constant 0 : index
    %106 = vector.load %arg9[%c2_120, %c0_121, %c1_122, %c0_123] : memref<4x4x10x8xf32, #tpu.memory_space<vmem>>, vector<1x2x8x8xf32>
    %107 = vector.shape_cast %106 : vector<1x2x8x8xf32> to vector<2x8x8xf32>
    %108 = vector.shape_cast %107 : vector<2x8x8xf32> to vector<16x8xf32>
    %cst_124 = arith.constant dense<0.000000e+00> : vector<16x4xf32>
    %109 = tpu.matmul %108, %15, %cst_124 {dimension_numbers = #tpu.dot_dimension_numbers<[1], [0], [0], [1], [0, 0, 1, 1], [], []>} : vector<16x8xf32>, vector<8x4xf32>, vector<16x4xf32> -> vector<16x4xf32>
    %110 = arith.addf %105, %109 : vector<16x4xf32>
    %c3_125 = arith.constant 3 : index
    %c0_126 = arith.constant 0 : index
    %c1_127 = arith.constant 1 : index
    %c0_128 = arith.constant 0 : index
    %111 = vector.load %arg9[%c3_125, %c0_126, %c1_127, %c0_128] : memref<4x4x10x8xf32, #tpu.memory_space<vmem>>, vector<1x2x8x8xf32>
    %112 = vector.shape_cast %111 : vector<1x2x8x8xf32> to vector<2x8x8xf32>
    %113 = vector.shape_cast %112 : vector<2x8x8xf32> to vector<16x8xf32>
    %cst_129 = arith.constant dense<0.000000e+00> : vector<16x4xf32>
    %114 = tpu.matmul %113, %17, %cst_129 {dimension_numbers = #tpu.dot_dimension_numbers<[1], [0], [0], [1], [0, 0, 1, 1], [], []>} : vector<16x8xf32>, vector<8x4xf32>, vector<16x4xf32> -> vector<16x4xf32>
    %115 = arith.addf %110, %114 : vector<16x4xf32>
    %c1_130 = arith.constant 1 : index
    %c1_131 = arith.constant 1 : index
    %c0_132 = arith.constant 0 : index
    %c0_133 = arith.constant 0 : index
    %116 = vector.load %arg9[%c1_130, %c1_131, %c0_132, %c0_133] : memref<4x4x10x8xf32, #tpu.memory_space<vmem>>, vector<1x2x8x8xf32>
    %117 = vector.shape_cast %116 : vector<1x2x8x8xf32> to vector<2x8x8xf32>
    %118 = vector.shape_cast %117 : vector<2x8x8xf32> to vector<16x8xf32>
    %cst_134 = arith.constant dense<0.000000e+00> : vector<16x4xf32>
    %119 = tpu.matmul %118, %19, %cst_134 {dimension_numbers = #tpu.dot_dimension_numbers<[1], [0], [0], [1], [0, 0, 1, 1], [], []>} : vector<16x8xf32>, vector<8x4xf32>, vector<16x4xf32> -> vector<16x4xf32>
    %120 = arith.addf %115, %119 : vector<16x4xf32>
    %c0_135 = arith.constant 0 : index
    %c1_136 = arith.constant 1 : index
    %c1_137 = arith.constant 1 : index
    %c0_138 = arith.constant 0 : index
    %121 = vector.load %arg9[%c0_135, %c1_136, %c1_137, %c0_138] : memref<4x4x10x8xf32, #tpu.memory_space<vmem>>, vector<1x2x8x8xf32>
    %122 = vector.shape_cast %121 : vector<1x2x8x8xf32> to vector<2x8x8xf32>
    %123 = vector.shape_cast %122 : vector<2x8x8xf32> to vector<16x8xf32>
    %cst_139 = arith.constant dense<0.000000e+00> : vector<16x4xf32>
    %124 = tpu.matmul %123, %21, %cst_139 {dimension_numbers = #tpu.dot_dimension_numbers<[1], [0], [0], [1], [0, 0, 1, 1], [], []>} : vector<16x8xf32>, vector<8x4xf32>, vector<16x4xf32> -> vector<16x4xf32>
    %125 = arith.addf %120, %124 : vector<16x4xf32>
    %c1_140 = arith.constant 1 : index
    %c1_141 = arith.constant 1 : index
    %c1_142 = arith.constant 1 : index
    %c0_143 = arith.constant 0 : index
    %126 = vector.load %arg9[%c1_140, %c1_141, %c1_142, %c0_143] : memref<4x4x10x8xf32, #tpu.memory_space<vmem>>, vector<1x2x8x8xf32>
    %127 = vector.shape_cast %126 : vector<1x2x8x8xf32> to vector<2x8x8xf32>
    %128 = vector.shape_cast %127 : vector<2x8x8xf32> to vector<16x8xf32>
    %cst_144 = arith.constant dense<0.000000e+00> : vector<16x4xf32>
    %129 = tpu.matmul %128, %23, %cst_144 {dimension_numbers = #tpu.dot_dimension_numbers<[1], [0], [0], [1], [0, 0, 1, 1], [], []>} : vector<16x8xf32>, vector<8x4xf32>, vector<16x4xf32> -> vector<16x4xf32>
    %130 = arith.addf %125, %129 : vector<16x4xf32>
    %c3_145 = arith.constant 3 : index
    %c1_146 = arith.constant 1 : index
    %c0_147 = arith.constant 0 : index
    %c0_148 = arith.constant 0 : index
    %131 = vector.load %arg9[%c3_145, %c1_146, %c0_147, %c0_148] : memref<4x4x10x8xf32, #tpu.memory_space<vmem>>, vector<1x2x8x8xf32>
    %132 = vector.shape_cast %131 : vector<1x2x8x8xf32> to vector<2x8x8xf32>
    %133 = vector.shape_cast %132 : vector<2x8x8xf32> to vector<16x8xf32>
    %cst_149 = arith.constant dense<0.000000e+00> : vector<16x4xf32>
    %134 = tpu.matmul %133, %25, %cst_149 {dimension_numbers = #tpu.dot_dimension_numbers<[1], [0], [0], [1], [0, 0, 1, 1], [], []>} : vector<16x8xf32>, vector<8x4xf32>, vector<16x4xf32> -> vector<16x4xf32>
    %135 = arith.addf %130, %134 : vector<16x4xf32>
    %c2_150 = arith.constant 2 : index
    %c1_151 = arith.constant 1 : index
    %c1_152 = arith.constant 1 : index
    %c0_153 = arith.constant 0 : index
    %136 = vector.load %arg9[%c2_150, %c1_151, %c1_152, %c0_153] : memref<4x4x10x8xf32, #tpu.memory_space<vmem>>, vector<1x2x8x8xf32>
    %137 = vector.shape_cast %136 : vector<1x2x8x8xf32> to vector<2x8x8xf32>
    %138 = vector.shape_cast %137 : vector<2x8x8xf32> to vector<16x8xf32>
    %cst_154 = arith.constant dense<0.000000e+00> : vector<16x4xf32>
    %139 = tpu.matmul %138, %27, %cst_154 {dimension_numbers = #tpu.dot_dimension_numbers<[1], [0], [0], [1], [0, 0, 1, 1], [], []>} : vector<16x8xf32>, vector<8x4xf32>, vector<16x4xf32> -> vector<16x4xf32>
    %140 = arith.addf %135, %139 : vector<16x4xf32>
    %c3_155 = arith.constant 3 : index
    %c1_156 = arith.constant 1 : index
    %c1_157 = arith.constant 1 : index
    %c0_158 = arith.constant 0 : index
    %141 = vector.load %arg9[%c3_155, %c1_156, %c1_157, %c0_158] : memref<4x4x10x8xf32, #tpu.memory_space<vmem>>, vector<1x2x8x8xf32>
    %142 = vector.shape_cast %141 : vector<1x2x8x8xf32> to vector<2x8x8xf32>
    %143 = vector.shape_cast %142 : vector<2x8x8xf32> to vector<16x8xf32>
    %cst_159 = arith.constant dense<0.000000e+00> : vector<16x4xf32>
    %144 = tpu.matmul %143, %29, %cst_159 {dimension_numbers = #tpu.dot_dimension_numbers<[1], [0], [0], [1], [0, 0, 1, 1], [], []>} : vector<16x8xf32>, vector<8x4xf32>, vector<16x4xf32> -> vector<16x4xf32>
    %145 = arith.addf %140, %144 : vector<16x4xf32>
    %146 = vector.broadcast %3 : vector<1x4xf32> to vector<16x4xf32>
    %147 = arith.addf %145, %146 : vector<16x4xf32>
    %cst_160 = arith.constant 0.000000e+00 : f32
    %148 = vector.broadcast %cst_160 : f32 to vector<16x4xf32>
    %149 = arith.maximumf %147, %148 : vector<16x4xf32>
    %150 = vector.shape_cast %149 : vector<16x4xf32> to vector<2x8x4xf32>
    %cst_161 = arith.constant 0.000000e+00 : f32
    %151 = vector.broadcast %cst_161 : f32 to vector<16x4xf32>
    %c2_162 = arith.constant 2 : index
    %c0_163 = arith.constant 0 : index
    %c1_164 = arith.constant 1 : index
    %c0_165 = arith.constant 0 : index
    %152 = vector.load %arg9[%c2_162, %c0_163, %c1_164, %c0_165] : memref<4x4x10x8xf32, #tpu.memory_space<vmem>>, vector<1x2x8x8xf32>
    %153 = vector.shape_cast %152 : vector<1x2x8x8xf32> to vector<2x8x8xf32>
    %154 = vector.shape_cast %153 : vector<2x8x8xf32> to vector<16x8xf32>
    %cst_166 = arith.constant dense<0.000000e+00> : vector<16x4xf32>
    %155 = tpu.matmul %154, %13, %cst_166 {dimension_numbers = #tpu.dot_dimension_numbers<[1], [0], [0], [1], [0, 0, 1, 1], [], []>} : vector<16x8xf32>, vector<8x4xf32>, vector<16x4xf32> -> vector<16x4xf32>
    %156 = arith.addf %151, %155 : vector<16x4xf32>
    %c3_167 = arith.constant 3 : index
    %c0_168 = arith.constant 0 : index
    %c1_169 = arith.constant 1 : index
    %c0_170 = arith.constant 0 : index
    %157 = vector.load %arg9[%c3_167, %c0_168, %c1_169, %c0_170] : memref<4x4x10x8xf32, #tpu.memory_space<vmem>>, vector<1x2x8x8xf32>
    %158 = vector.shape_cast %157 : vector<1x2x8x8xf32> to vector<2x8x8xf32>
    %159 = vector.shape_cast %158 : vector<2x8x8xf32> to vector<16x8xf32>
    %cst_171 = arith.constant dense<0.000000e+00> : vector<16x4xf32>
    %160 = tpu.matmul %159, %15, %cst_171 {dimension_numbers = #tpu.dot_dimension_numbers<[1], [0], [0], [1], [0, 0, 1, 1], [], []>} : vector<16x8xf32>, vector<8x4xf32>, vector<16x4xf32> -> vector<16x4xf32>
    %161 = arith.addf %156, %160 : vector<16x4xf32>
    %c2_172 = arith.constant 2 : index
    %c0_173 = arith.constant 0 : index
    %c2_174 = arith.constant 2 : index
    %c0_175 = arith.constant 0 : index
    %162 = vector.load %arg9[%c2_172, %c0_173, %c2_174, %c0_175] : memref<4x4x10x8xf32, #tpu.memory_space<vmem>>, vector<1x2x8x8xf32>
    %163 = vector.shape_cast %162 : vector<1x2x8x8xf32> to vector<2x8x8xf32>
    %164 = vector.shape_cast %163 : vector<2x8x8xf32> to vector<16x8xf32>
    %cst_176 = arith.constant dense<0.000000e+00> : vector<16x4xf32>
    %165 = tpu.matmul %164, %17, %cst_176 {dimension_numbers = #tpu.dot_dimension_numbers<[1], [0], [0], [1], [0, 0, 1, 1], [], []>} : vector<16x8xf32>, vector<8x4xf32>, vector<16x4xf32> -> vector<16x4xf32>
    %166 = arith.addf %161, %165 : vector<16x4xf32>
    %c0_177 = arith.constant 0 : index
    %c1_178 = arith.constant 1 : index
    %c1_179 = arith.constant 1 : index
    %c0_180 = arith.constant 0 : index
    %167 = vector.load %arg9[%c0_177, %c1_178, %c1_179, %c0_180] : memref<4x4x10x8xf32, #tpu.memory_space<vmem>>, vector<1x2x8x8xf32>
    %168 = vector.shape_cast %167 : vector<1x2x8x8xf32> to vector<2x8x8xf32>
    %169 = vector.shape_cast %168 : vector<2x8x8xf32> to vector<16x8xf32>
    %cst_181 = arith.constant dense<0.000000e+00> : vector<16x4xf32>
    %170 = tpu.matmul %169, %19, %cst_181 {dimension_numbers = #tpu.dot_dimension_numbers<[1], [0], [0], [1], [0, 0, 1, 1], [], []>} : vector<16x8xf32>, vector<8x4xf32>, vector<16x4xf32> -> vector<16x4xf32>
    %171 = arith.addf %166, %170 : vector<16x4xf32>
    %c1_182 = arith.constant 1 : index
    %c1_183 = arith.constant 1 : index
    %c1_184 = arith.constant 1 : index
    %c0_185 = arith.constant 0 : index
    %172 = vector.load %arg9[%c1_182, %c1_183, %c1_184, %c0_185] : memref<4x4x10x8xf32, #tpu.memory_space<vmem>>, vector<1x2x8x8xf32>
    %173 = vector.shape_cast %172 : vector<1x2x8x8xf32> to vector<2x8x8xf32>
    %174 = vector.shape_cast %173 : vector<2x8x8xf32> to vector<16x8xf32>
    %cst_186 = arith.constant dense<0.000000e+00> : vector<16x4xf32>
    %175 = tpu.matmul %174, %21, %cst_186 {dimension_numbers = #tpu.dot_dimension_numbers<[1], [0], [0], [1], [0, 0, 1, 1], [], []>} : vector<16x8xf32>, vector<8x4xf32>, vector<16x4xf32> -> vector<16x4xf32>
    %176 = arith.addf %171, %175 : vector<16x4xf32>
    %c0_187 = arith.constant 0 : index
    %c1_188 = arith.constant 1 : index
    %c2_189 = arith.constant 2 : index
    %c0_190 = arith.constant 0 : index
    %177 = vector.load %arg9[%c0_187, %c1_188, %c2_189, %c0_190] : memref<4x4x10x8xf32, #tpu.memory_space<vmem>>, vector<1x2x8x8xf32>
    %178 = vector.shape_cast %177 : vector<1x2x8x8xf32> to vector<2x8x8xf32>
    %179 = vector.shape_cast %178 : vector<2x8x8xf32> to vector<16x8xf32>
    %cst_191 = arith.constant dense<0.000000e+00> : vector<16x4xf32>
    %180 = tpu.matmul %179, %23, %cst_191 {dimension_numbers = #tpu.dot_dimension_numbers<[1], [0], [0], [1], [0, 0, 1, 1], [], []>} : vector<16x8xf32>, vector<8x4xf32>, vector<16x4xf32> -> vector<16x4xf32>
    %181 = arith.addf %176, %180 : vector<16x4xf32>
    %c2_192 = arith.constant 2 : index
    %c1_193 = arith.constant 1 : index
    %c1_194 = arith.constant 1 : index
    %c0_195 = arith.constant 0 : index
    %182 = vector.load %arg9[%c2_192, %c1_193, %c1_194, %c0_195] : memref<4x4x10x8xf32, #tpu.memory_space<vmem>>, vector<1x2x8x8xf32>
    %183 = vector.shape_cast %182 : vector<1x2x8x8xf32> to vector<2x8x8xf32>
    %184 = vector.shape_cast %183 : vector<2x8x8xf32> to vector<16x8xf32>
    %cst_196 = arith.constant dense<0.000000e+00> : vector<16x4xf32>
    %185 = tpu.matmul %184, %25, %cst_196 {dimension_numbers = #tpu.dot_dimension_numbers<[1], [0], [0], [1], [0, 0, 1, 1], [], []>} : vector<16x8xf32>, vector<8x4xf32>, vector<16x4xf32> -> vector<16x4xf32>
    %186 = arith.addf %181, %185 : vector<16x4xf32>
    %c3_197 = arith.constant 3 : index
    %c1_198 = arith.constant 1 : index
    %c1_199 = arith.constant 1 : index
    %c0_200 = arith.constant 0 : index
    %187 = vector.load %arg9[%c3_197, %c1_198, %c1_199, %c0_200] : memref<4x4x10x8xf32, #tpu.memory_space<vmem>>, vector<1x2x8x8xf32>
    %188 = vector.shape_cast %187 : vector<1x2x8x8xf32> to vector<2x8x8xf32>
    %189 = vector.shape_cast %188 : vector<2x8x8xf32> to vector<16x8xf32>
    %cst_201 = arith.constant dense<0.000000e+00> : vector<16x4xf32>
    %190 = tpu.matmul %189, %27, %cst_201 {dimension_numbers = #tpu.dot_dimension_numbers<[1], [0], [0], [1], [0, 0, 1, 1], [], []>} : vector<16x8xf32>, vector<8x4xf32>, vector<16x4xf32> -> vector<16x4xf32>
    %191 = arith.addf %186, %190 : vector<16x4xf32>
    %c2_202 = arith.constant 2 : index
    %c1_203 = arith.constant 1 : index
    %c2_204 = arith.constant 2 : index
    %c0_205 = arith.constant 0 : index
    %192 = vector.load %arg9[%c2_202, %c1_203, %c2_204, %c0_205] : memref<4x4x10x8xf32, #tpu.memory_space<vmem>>, vector<1x2x8x8xf32>
    %193 = vector.shape_cast %192 : vector<1x2x8x8xf32> to vector<2x8x8xf32>
    %194 = vector.shape_cast %193 : vector<2x8x8xf32> to vector<16x8xf32>
    %cst_206 = arith.constant dense<0.000000e+00> : vector<16x4xf32>
    %195 = tpu.matmul %194, %29, %cst_206 {dimension_numbers = #tpu.dot_dimension_numbers<[1], [0], [0], [1], [0, 0, 1, 1], [], []>} : vector<16x8xf32>, vector<8x4xf32>, vector<16x4xf32> -> vector<16x4xf32>
    %196 = arith.addf %191, %195 : vector<16x4xf32>
    %197 = vector.broadcast %3 : vector<1x4xf32> to vector<16x4xf32>
    %198 = arith.addf %196, %197 : vector<16x4xf32>
    %cst_207 = arith.constant 0.000000e+00 : f32
    %199 = vector.broadcast %cst_207 : f32 to vector<16x4xf32>
    %200 = arith.maximumf %198, %199 : vector<16x4xf32>
    %201 = vector.shape_cast %200 : vector<16x4xf32> to vector<2x8x4xf32>
    %202 = vector.shape_cast %150 : vector<2x8x4xf32> to vector<2x8x1x4xf32>
    %203 = vector.shape_cast %201 : vector<2x8x4xf32> to vector<2x8x1x4xf32>
    %204 = tpu.concatenate %202, %203 in 2 : vector<2x8x1x4xf32>, vector<2x8x1x4xf32> -> vector<2x8x2x4xf32>
    %c0_208 = arith.constant 0 : index
    %c0_209 = arith.constant 0 : index
    %c0_210 = arith.constant 0 : index
    %c0_211 = arith.constant 0 : index
    %c0_212 = arith.constant 0 : index
    %c0_213 = arith.constant 0 : index
    %205 = vector.load %arg8[%c0_208, %c0_209, %c0_210, %c0_211, %c0_212, %c0_213] : memref<1x2x2x8x2x4xf32, #tpu.memory_space<vmem>>, vector<1x2x1x8x2x4xf32>
    %206 = vector.shape_cast %205 : vector<1x2x1x8x2x4xf32> to vector<2x8x2x4xf32>
    %207 = vector.shape_cast %204 : vector<2x8x2x4xf32> to vector<1x2x1x8x2x4xf32>
    tpu.vector_store %arg8[%c0_208, %c0_209, %c0_210, %c0_211, %c0_212, %c0_213], %207 {strides = array<i32>} : memref<1x2x2x8x2x4xf32, #tpu.memory_space<vmem>>, vector<1x2x1x8x2x4xf32>,
    %cst_214 = arith.constant 0.000000e+00 : f32
    %208 = vector.broadcast %cst_214 : f32 to vector<16x4xf32>
    %c1_215 = arith.constant 1 : index
    %c1_216 = arith.constant 1 : index
    %c0_217 = arith.constant 0 : index
    %c0_218 = arith.constant 0 : index
    %209 = vector.load %arg9[%c1_215, %c1_216, %c0_217, %c0_218] : memref<4x4x10x8xf32, #tpu.memory_space<vmem>>, vector<1x2x8x8xf32>
    %210 = vector.shape_cast %209 : vector<1x2x8x8xf32> to vector<2x8x8xf32>
    %211 = vector.shape_cast %210 : vector<2x8x8xf32> to vector<16x8xf32>
    %cst_219 = arith.constant dense<0.000000e+00> : vector<16x4xf32>
    %212 = tpu.matmul %211, %13, %cst_219 {dimension_numbers = #tpu.dot_dimension_numbers<[1], [0], [0], [1], [0, 0, 1, 1], [], []>} : vector<16x8xf32>, vector<8x4xf32>, vector<16x4xf32> -> vector<16x4xf32>
    %213 = arith.addf %208, %212 : vector<16x4xf32>
    %c0_220 = arith.constant 0 : index
    %c1_221 = arith.constant 1 : index
    %c1_222 = arith.constant 1 : index
    %c0_223 = arith.constant 0 : index
    %214 = vector.load %arg9[%c0_220, %c1_221, %c1_222, %c0_223] : memref<4x4x10x8xf32, #tpu.memory_space<vmem>>, vector<1x2x8x8xf32>
    %215 = vector.shape_cast %214 : vector<1x2x8x8xf32> to vector<2x8x8xf32>
    %216 = vector.shape_cast %215 : vector<2x8x8xf32> to vector<16x8xf32>
    %cst_224 = arith.constant dense<0.000000e+00> : vector<16x4xf32>
    %217 = tpu.matmul %216, %15, %cst_224 {dimension_numbers = #tpu.dot_dimension_numbers<[1], [0], [0], [1], [0, 0, 1, 1], [], []>} : vector<16x8xf32>, vector<8x4xf32>, vector<16x4xf32> -> vector<16x4xf32>
    %218 = arith.addf %213, %217 : vector<16x4xf32>
    %c1_225 = arith.constant 1 : index
    %c1_226 = arith.constant 1 : index
    %c1_227 = arith.constant 1 : index
    %c0_228 = arith.constant 0 : index
    %219 = vector.load %arg9[%c1_225, %c1_226, %c1_227, %c0_228] : memref<4x4x10x8xf32, #tpu.memory_space<vmem>>, vector<1x2x8x8xf32>
    %220 = vector.shape_cast %219 : vector<1x2x8x8xf32> to vector<2x8x8xf32>
    %221 = vector.shape_cast %220 : vector<2x8x8xf32> to vector<16x8xf32>
    %cst_229 = arith.constant dense<0.000000e+00> : vector<16x4xf32>
    %222 = tpu.matmul %221, %17, %cst_229 {dimension_numbers = #tpu.dot_dimension_numbers<[1], [0], [0], [1], [0, 0, 1, 1], [], []>} : vector<16x8xf32>, vector<8x4xf32>, vector<16x4xf32> -> vector<16x4xf32>
    %223 = arith.addf %218, %222 : vector<16x4xf32>
    %c3_230 = arith.constant 3 : index
    %c1_231 = arith.constant 1 : index
    %c0_232 = arith.constant 0 : index
    %c0_233 = arith.constant 0 : index
    %224 = vector.load %arg9[%c3_230, %c1_231, %c0_232, %c0_233] : memref<4x4x10x8xf32, #tpu.memory_space<vmem>>, vector<1x2x8x8xf32>
    %225 = vector.shape_cast %224 : vector<1x2x8x8xf32> to vector<2x8x8xf32>
    %226 = vector.shape_cast %225 : vector<2x8x8xf32> to vector<16x8xf32>
    %cst_234 = arith.constant dense<0.000000e+00> : vector<16x4xf32>
    %227 = tpu.matmul %226, %19, %cst_234 {dimension_numbers = #tpu.dot_dimension_numbers<[1], [0], [0], [1], [0, 0, 1, 1], [], []>} : vector<16x8xf32>, vector<8x4xf32>, vector<16x4xf32> -> vector<16x4xf32>
    %228 = arith.addf %223, %227 : vector<16x4xf32>
    %c2_235 = arith.constant 2 : index
    %c1_236 = arith.constant 1 : index
    %c1_237 = arith.constant 1 : index
    %c0_238 = arith.constant 0 : index
    %229 = vector.load %arg9[%c2_235, %c1_236, %c1_237, %c0_238] : memref<4x4x10x8xf32, #tpu.memory_space<vmem>>, vector<1x2x8x8xf32>
    %230 = vector.shape_cast %229 : vector<1x2x8x8xf32> to vector<2x8x8xf32>
    %231 = vector.shape_cast %230 : vector<2x8x8xf32> to vector<16x8xf32>
    %cst_239 = arith.constant dense<0.000000e+00> : vector<16x4xf32>
    %232 = tpu.matmul %231, %21, %cst_239 {dimension_numbers = #tpu.dot_dimension_numbers<[1], [0], [0], [1], [0, 0, 1, 1], [], []>} : vector<16x8xf32>, vector<8x4xf32>, vector<16x4xf32> -> vector<16x4xf32>
    %233 = arith.addf %228, %232 : vector<16x4xf32>
    %c3_240 = arith.constant 3 : index
    %c1_241 = arith.constant 1 : index
    %c1_242 = arith.constant 1 : index
    %c0_243 = arith.constant 0 : index
    %234 = vector.load %arg9[%c3_240, %c1_241, %c1_242, %c0_243] : memref<4x4x10x8xf32, #tpu.memory_space<vmem>>, vector<1x2x8x8xf32>
    %235 = vector.shape_cast %234 : vector<1x2x8x8xf32> to vector<2x8x8xf32>
    %236 = vector.shape_cast %235 : vector<2x8x8xf32> to vector<16x8xf32>
    %cst_244 = arith.constant dense<0.000000e+00> : vector<16x4xf32>
    %237 = tpu.matmul %236, %23, %cst_244 {dimension_numbers = #tpu.dot_dimension_numbers<[1], [0], [0], [1], [0, 0, 1, 1], [], []>} : vector<16x8xf32>, vector<8x4xf32>, vector<16x4xf32> -> vector<16x4xf32>
    %238 = arith.addf %233, %237 : vector<16x4xf32>
    %c1_245 = arith.constant 1 : index
    %c2_246 = arith.constant 2 : index
    %c0_247 = arith.constant 0 : index
    %c0_248 = arith.constant 0 : index
    %239 = vector.load %arg9[%c1_245, %c2_246, %c0_247, %c0_248] : memref<4x4x10x8xf32, #tpu.memory_space<vmem>>, vector<1x2x8x8xf32>
    %240 = vector.shape_cast %239 : vector<1x2x8x8xf32> to vector<2x8x8xf32>
    %241 = vector.shape_cast %240 : vector<2x8x8xf32> to vector<16x8xf32>
    %cst_249 = arith.constant dense<0.000000e+00> : vector<16x4xf32>
    %242 = tpu.matmul %241, %25, %cst_249 {dimension_numbers = #tpu.dot_dimension_numbers<[1], [0], [0], [1], [0, 0, 1, 1], [], []>} : vector<16x8xf32>, vector<8x4xf32>, vector<16x4xf32> -> vector<16x4xf32>
    %243 = arith.addf %238, %242 : vector<16x4xf32>
    %c0_250 = arith.constant 0 : index
    %c2_251 = arith.constant 2 : index
    %c1_252 = arith.constant 1 : index
    %c0_253 = arith.constant 0 : index
    %244 = vector.load %arg9[%c0_250, %c2_251, %c1_252, %c0_253] : memref<4x4x10x8xf32, #tpu.memory_space<vmem>>, vector<1x2x8x8xf32>
    %245 = vector.shape_cast %244 : vector<1x2x8x8xf32> to vector<2x8x8xf32>
    %246 = vector.shape_cast %245 : vector<2x8x8xf32> to vector<16x8xf32>
    %cst_254 = arith.constant dense<0.000000e+00> : vector<16x4xf32>
    %247 = tpu.matmul %246, %27, %cst_254 {dimension_numbers = #tpu.dot_dimension_numbers<[1], [0], [0], [1], [0, 0, 1, 1], [], []>} : vector<16x8xf32>, vector<8x4xf32>, vector<16x4xf32> -> vector<16x4xf32>
    %248 = arith.addf %243, %247 : vector<16x4xf32>
    %c1_255 = arith.constant 1 : index
    %c2_256 = arith.constant 2 : index
    %c1_257 = arith.constant 1 : index
    %c0_258 = arith.constant 0 : index
    %249 = vector.load %arg9[%c1_255, %c2_256, %c1_257, %c0_258] : memref<4x4x10x8xf32, #tpu.memory_space<vmem>>, vector<1x2x8x8xf32>
    %250 = vector.shape_cast %249 : vector<1x2x8x8xf32> to vector<2x8x8xf32>
    %251 = vector.shape_cast %250 : vector<2x8x8xf32> to vector<16x8xf32>
    %cst_259 = arith.constant dense<0.000000e+00> : vector<16x4xf32>
    %252 = tpu.matmul %251, %29, %cst_259 {dimension_numbers = #tpu.dot_dimension_numbers<[1], [0], [0], [1], [0, 0, 1, 1], [], []>} : vector<16x8xf32>, vector<8x4xf32>, vector<16x4xf32> -> vector<16x4xf32>
    %253 = arith.addf %248, %252 : vector<16x4xf32>
    %254 = vector.broadcast %3 : vector<1x4xf32> to vector<16x4xf32>
    %255 = arith.addf %253, %254 : vector<16x4xf32>
    %cst_260 = arith.constant 0.000000e+00 : f32
    %256 = vector.broadcast %cst_260 : f32 to vector<16x4xf32>
    %257 = arith.maximumf %255, %256 : vector<16x4xf32>
    %258 = vector.shape_cast %257 : vector<16x4xf32> to vector<2x8x4xf32>
    %cst_261 = arith.constant 0.000000e+00 : f32
    %259 = vector.broadcast %cst_261 : f32 to vector<16x4xf32>
    %c0_262 = arith.constant 0 : index
    %c1_263 = arith.constant 1 : index
    %c1_264 = arith.constant 1 : index
    %c0_265 = arith.constant 0 : index
    %260 = vector.load %arg9[%c0_262, %c1_263, %c1_264, %c0_265] : memref<4x4x10x8xf32, #tpu.memory_space<vmem>>, vector<1x2x8x8xf32>
    %261 = vector.shape_cast %260 : vector<1x2x8x8xf32> to vector<2x8x8xf32>
    %262 = vector.shape_cast %261 : vector<2x8x8xf32> to vector<16x8xf32>
    %cst_266 = arith.constant dense<0.000000e+00> : vector<16x4xf32>
    %263 = tpu.matmul %262, %13, %cst_266 {dimension_numbers = #tpu.dot_dimension_numbers<[1], [0], [0], [1], [0, 0, 1, 1], [], []>} : vector<16x8xf32>, vector<8x4xf32>, vector<16x4xf32> -> vector<16x4xf32>
    %264 = arith.addf %259, %263 : vector<16x4xf32>
    %c1_267 = arith.constant 1 : index
    %c1_268 = arith.constant 1 : index
    %c1_269 = arith.constant 1 : index
    %c0_270 = arith.constant 0 : index
    %265 = vector.load %arg9[%c1_267, %c1_268, %c1_269, %c0_270] : memref<4x4x10x8xf32, #tpu.memory_space<vmem>>, vector<1x2x8x8xf32>
    %266 = vector.shape_cast %265 : vector<1x2x8x8xf32> to vector<2x8x8xf32>
    %267 = vector.shape_cast %266 : vector<2x8x8xf32> to vector<16x8xf32>
    %cst_271 = arith.constant dense<0.000000e+00> : vector<16x4xf32>
    %268 = tpu.matmul %267, %15, %cst_271 {dimension_numbers = #tpu.dot_dimension_numbers<[1], [0], [0], [1], [0, 0, 1, 1], [], []>} : vector<16x8xf32>, vector<8x4xf32>, vector<16x4xf32> -> vector<16x4xf32>
    %269 = arith.addf %264, %268 : vector<16x4xf32>
    %c0_272 = arith.constant 0 : index
    %c1_273 = arith.constant 1 : index
    %c2_274 = arith.constant 2 : index
    %c0_275 = arith.constant 0 : index
    %270 = vector.load %arg9[%c0_272, %c1_273, %c2_274, %c0_275] : memref<4x4x10x8xf32, #tpu.memory_space<vmem>>, vector<1x2x8x8xf32>
    %271 = vector.shape_cast %270 : vector<1x2x8x8xf32> to vector<2x8x8xf32>
    %272 = vector.shape_cast %271 : vector<2x8x8xf32> to vector<16x8xf32>
    %cst_276 = arith.constant dense<0.000000e+00> : vector<16x4xf32>
    %273 = tpu.matmul %272, %17, %cst_276 {dimension_numbers = #tpu.dot_dimension_numbers<[1], [0], [0], [1], [0, 0, 1, 1], [], []>} : vector<16x8xf32>, vector<8x4xf32>, vector<16x4xf32> -> vector<16x4xf32>
    %274 = arith.addf %269, %273 : vector<16x4xf32>
    %c2_277 = arith.constant 2 : index
    %c1_278 = arith.constant 1 : index
    %c1_279 = arith.constant 1 : index
    %c0_280 = arith.constant 0 : index
    %275 = vector.load %arg9[%c2_277, %c1_278, %c1_279, %c0_280] : memref<4x4x10x8xf32, #tpu.memory_space<vmem>>, vector<1x2x8x8xf32>
    %276 = vector.shape_cast %275 : vector<1x2x8x8xf32> to vector<2x8x8xf32>
    %277 = vector.shape_cast %276 : vector<2x8x8xf32> to vector<16x8xf32>
    %cst_281 = arith.constant dense<0.000000e+00> : vector<16x4xf32>
    %278 = tpu.matmul %277, %19, %cst_281 {dimension_numbers = #tpu.dot_dimension_numbers<[1], [0], [0], [1], [0, 0, 1, 1], [], []>} : vector<16x8xf32>, vector<8x4xf32>, vector<16x4xf32> -> vector<16x4xf32>
    %279 = arith.addf %274, %278 : vector<16x4xf32>
    %c3_282 = arith.constant 3 : index
    %c1_283 = arith.constant 1 : index
    %c1_284 = arith.constant 1 : index
    %c0_285 = arith.constant 0 : index
    %280 = vector.load %arg9[%c3_282, %c1_283, %c1_284, %c0_285] : memref<4x4x10x8xf32, #tpu.memory_space<vmem>>, vector<1x2x8x8xf32>
    %281 = vector.shape_cast %280 : vector<1x2x8x8xf32> to vector<2x8x8xf32>
    %282 = vector.shape_cast %281 : vector<2x8x8xf32> to vector<16x8xf32>
    %cst_286 = arith.constant dense<0.000000e+00> : vector<16x4xf32>
    %283 = tpu.matmul %282, %21, %cst_286 {dimension_numbers = #tpu.dot_dimension_numbers<[1], [0], [0], [1], [0, 0, 1, 1], [], []>} : vector<16x8xf32>, vector<8x4xf32>, vector<16x4xf32> -> vector<16x4xf32>
    %284 = arith.addf %279, %283 : vector<16x4xf32>
    %c2_287 = arith.constant 2 : index
    %c1_288 = arith.constant 1 : index
    %c2_289 = arith.constant 2 : index
    %c0_290 = arith.constant 0 : index
    %285 = vector.load %arg9[%c2_287, %c1_288, %c2_289, %c0_290] : memref<4x4x10x8xf32, #tpu.memory_space<vmem>>, vector<1x2x8x8xf32>
    %286 = vector.shape_cast %285 : vector<1x2x8x8xf32> to vector<2x8x8xf32>
    %287 = vector.shape_cast %286 : vector<2x8x8xf32> to vector<16x8xf32>
    %cst_291 = arith.constant dense<0.000000e+00> : vector<16x4xf32>
    %288 = tpu.matmul %287, %23, %cst_291 {dimension_numbers = #tpu.dot_dimension_numbers<[1], [0], [0], [1], [0, 0, 1, 1], [], []>} : vector<16x8xf32>, vector<8x4xf32>, vector<16x4xf32> -> vector<16x4xf32>
    %289 = arith.addf %284, %288 : vector<16x4xf32>
    %c0_292 = arith.constant 0 : index
    %c2_293 = arith.constant 2 : index
    %c1_294 = arith.constant 1 : index
    %c0_295 = arith.constant 0 : index
    %290 = vector.load %arg9[%c0_292, %c2_293, %c1_294, %c0_295] : memref<4x4x10x8xf32, #tpu.memory_space<vmem>>, vector<1x2x8x8xf32>
    %291 = vector.shape_cast %290 : vector<1x2x8x8xf32> to vector<2x8x8xf32>
    %292 = vector.shape_cast %291 : vector<2x8x8xf32> to vector<16x8xf32>
    %cst_296 = arith.constant dense<0.000000e+00> : vector<16x4xf32>
    %293 = tpu.matmul %292, %25, %cst_296 {dimension_numbers = #tpu.dot_dimension_numbers<[1], [0], [0], [1], [0, 0, 1, 1], [], []>} : vector<16x8xf32>, vector<8x4xf32>, vector<16x4xf32> -> vector<16x4xf32>
    %294 = arith.addf %289, %293 : vector<16x4xf32>
    %c1_297 = arith.constant 1 : index
    %c2_298 = arith.constant 2 : index
    %c1_299 = arith.constant 1 : index
    %c0_300 = arith.constant 0 : index
    %295 = vector.load %arg9[%c1_297, %c2_298, %c1_299, %c0_300] : memref<4x4x10x8xf32, #tpu.memory_space<vmem>>, vector<1x2x8x8xf32>
    %296 = vector.shape_cast %295 : vector<1x2x8x8xf32> to vector<2x8x8xf32>
    %297 = vector.shape_cast %296 : vector<2x8x8xf32> to vector<16x8xf32>
    %cst_301 = arith.constant dense<0.000000e+00> : vector<16x4xf32>
    %298 = tpu.matmul %297, %27, %cst_301 {dimension_numbers = #tpu.dot_dimension_numbers<[1], [0], [0], [1], [0, 0, 1, 1], [], []>} : vector<16x8xf32>, vector<8x4xf32>, vector<16x4xf32> -> vector<16x4xf32>
    %299 = arith.addf %294, %298 : vector<16x4xf32>
    %c0_302 = arith.constant 0 : index
    %c2_303 = arith.constant 2 : index
    %c2_304 = arith.constant 2 : index
    %c0_305 = arith.constant 0 : index
    %300 = vector.load %arg9[%c0_302, %c2_303, %c2_304, %c0_305] : memref<4x4x10x8xf32, #tpu.memory_space<vmem>>, vector<1x2x8x8xf32>
    %301 = vector.shape_cast %300 : vector<1x2x8x8xf32> to vector<2x8x8xf32>
    %302 = vector.shape_cast %301 : vector<2x8x8xf32> to vector<16x8xf32>
    %cst_306 = arith.constant dense<0.000000e+00> : vector<16x4xf32>
    %303 = tpu.matmul %302, %29, %cst_306 {dimension_numbers = #tpu.dot_dimension_numbers<[1], [0], [0], [1], [0, 0, 1, 1], [], []>} : vector<16x8xf32>, vector<8x4xf32>, vector<16x4xf32> -> vector<16x4xf32>
    %304 = arith.addf %299, %303 : vector<16x4xf32>
    %305 = vector.broadcast %3 : vector<1x4xf32> to vector<16x4xf32>
    %306 = arith.addf %304, %305 : vector<16x4xf32>
    %cst_307 = arith.constant 0.000000e+00 : f32
    %307 = vector.broadcast %cst_307 : f32 to vector<16x4xf32>
    %308 = arith.maximumf %306, %307 : vector<16x4xf32>
    %309 = vector.shape_cast %308 : vector<16x4xf32> to vector<2x8x4xf32>
    %310 = vector.shape_cast %258 : vector<2x8x4xf32> to vector<2x8x1x4xf32>
    %311 = vector.shape_cast %309 : vector<2x8x4xf32> to vector<2x8x1x4xf32>
    %312 = tpu.concatenate %310, %311 in 2 : vector<2x8x1x4xf32>, vector<2x8x1x4xf32> -> vector<2x8x2x4xf32>
    %c0_308 = arith.constant 0 : index
    %c0_309 = arith.constant 0 : index
    %c1_310 = arith.constant 1 : index
    %c0_311 = arith.constant 0 : index
    %c0_312 = arith.constant 0 : index
    %c0_313 = arith.constant 0 : index
    %313 = vector.load %arg8[%c0_308, %c0_309, %c1_310, %c0_311, %c0_312, %c0_313] : memref<1x2x2x8x2x4xf32, #tpu.memory_space<vmem>>, vector<1x2x1x8x2x4xf32>
    %314 = vector.shape_cast %313 : vector<1x2x1x8x2x4xf32> to vector<2x8x2x4xf32>
    %315 = vector.shape_cast %312 : vector<2x8x2x4xf32> to vector<1x2x1x8x2x4xf32>
    tpu.vector_store %arg8[%c0_308, %c0_309, %c1_310, %c0_311, %c0_312, %c0_313], %315 {strides = array<i32>} : memref<1x2x2x8x2x4xf32, #tpu.memory_space<vmem>>, vector<1x2x1x8x2x4xf32>,
    return
  }
  func.func @transform_0(%arg0: i32, %arg1: i32) -> (i32, i32, i32, i32) {
    %c0_i32 = arith.constant 0 : i32
    %c0_i32_0 = arith.constant 0 : i32
    %c0_i32_1 = arith.constant 0 : i32
    %c0_i32_2 = arith.constant 0 : i32
    return %arg0, %c0_i32, %c0_i32_0, %c0_i32_1 : i32, i32, i32, i32
  }
  func.func @transform_1(%arg0: i32, %arg1: i32) -> (i32, i32, i32, i32, i32, i32) {
    %c0_i32 = arith.constant 0 : i32
    %c0_i32_0 = arith.constant 0 : i32
    %c0_i32_1 = arith.constant 0 : i32
    %c0_i32_2 = arith.constant 0 : i32
    %c0_i32_3 = arith.constant 0 : i32
    %c0_i32_4 = arith.constant 0 : i32
    return %arg0, %c0_i32, %c0_i32_0, %c0_i32_1, %c0_i32_2, %c0_i32_3 : i32, i32, i32, i32, i32, i32
  }
  func.func @transform_2(%arg0: i32, %arg1: i32) -> (i32, i32, i32) {
    %c0_i32 = arith.constant 0 : i32
    %c0_i32_0 = arith.constant 0 : i32
    %c0_i32_1 = arith.constant 0 : i32
    %c0_i32_2 = arith.constant 0 : i32
    return %c0_i32, %c0_i32_0, %c0_i32_1 : i32, i32, i32
  }
  func.func @transform_3(%arg0: i32, %arg1: i32) -> (i32, i32) {
    %c0_i32 = arith.constant 0 : i32
    %c0_i32_0 = arith.constant 0 : i32
    %c0_i32_1 = arith.constant 0 : i32
    return %c0_i32, %c0_i32_0 : i32, i32
  }
  func.func @transform_4(%arg0: i32, %arg1: i32) -> (i32, i32, i32, i32) {
    %c0_i32 = arith.constant 0 : i32
    %c0_i32_0 = arith.constant 0 : i32
    %c0_i32_1 = arith.constant 0 : i32
    %c0_i32_2 = arith.constant 0 : i32
    %c0_i32_3 = arith.constant 0 : i32
    return %c0_i32, %c0_i32_0, %c0_i32_1, %c0_i32_2 : i32, i32, i32, i32
  }
  func.func @transform_5(%arg0: i32, %arg1: i32) -> (i32, i32) {
    %c0_i32 = arith.constant 0 : i32
    %c0_i32_0 = arith.constant 0 : i32
    %c0_i32_1 = arith.constant 0 : i32
    return %c0_i32, %c0_i32_0 : i32, i32
  }
  func.func @transform_6(%arg0: i32, %arg1: i32) -> (i32, i32, i32, i32, i32, i32) {
    %c0_i32 = arith.constant 0 : i32
    %c0_i32_0 = arith.constant 0 : i32
    %c0_i32_1 = arith.constant 0 : i32
    %c0_i32_2 = arith.constant 0 : i32
    %c0_i32_3 = arith.constant 0 : i32
    return %arg0, %arg1, %c0_i32, %c0_i32_0, %c0_i32_1, %c0_i32_2 : i32, i32, i32, i32, i32, i32
  }
}

</mosaic_0001>

<bundles_post_ra>
// kernel: decoder_forward.1
= control target key start
LH: loop header
LB: loop body
LE: loop exit
PB: predicated region body
PF: predicated region fallthrough
CT: control target
= control target key end

     0   :  { %s2864_s21 = smov 0   ;;  %s2866_s22 = smov 0   ;;  %s3643_s0 = inlined_call_operand.vmem [shape: f32[2,8,8,8], index: 0, kind: input, shape index: {}]   ;;  %s3644_s1 = inlined_call_operand.vmem [shape: f32[2,8,2,8,2,4], index: 1, kind: input, shape index: {}]   ;;  %s3645_s2 = inlined_call_operand.vmem [shape: f32[4,8,4], index: 2, kind: input, shape index: {}]   ;;  %s3646_s3 = inlined_call_operand.vmem [shape: f32[1,4], index: 3, kind: input, shape index: {}]   ;;  %s3647_s4 = inlined_call_operand.vmem [shape: f32[3,3,8,4], index: 4, kind: input, shape index: {}]   ;;  %s3648_s5 = inlined_call_operand.vmem [shape: f32[1,4], index: 5, kind: input, shape index: {}]   ;;  %s3649_s6 = inlined_call_operand.vmem [shape: f32[2,8,2,8,2,4], index: 6, kind: output, shape index: {}]  }
   0x1   :  { %s2868_s23 = smov 0   ;;  %s2870_s24 = smov 0  }
   0x2   :  { %s2872_s25 = smov 0  }
   0x3 LB: > { %s25_s26 = sadd.s32 1, %s2815_s23  ;;  %s28_s27 = sadd.s32 1, %s2819_s24  ;;  %s2823_s25 = sphi %s2872_s25, %s16_s25   ;;  %s2819_s24 = sphi %s2870_s24, %s3653_s24   ;;  %s2815_s23 = sphi %s2868_s23, %s3652_s23   ;;  %s2811_s22 = sphi %s2866_s22, %s3651_s22   ;;  %s2807_s21 = sphi %s2864_s21, %s3650_s21  }
   0x4   : > { %p26_p0 = scmp.ge.s32.totalorder %s25_s26, 4  ;;  %p2550_p1 = scmp.ge.s32.totalorder %s2823_s25, 1 }
   0x5   : > { %p236_p2 = scmp.lt.s32.totalorder %s2823_s25, 9 }
   0x6   : > { %s3655_s26 = smov (%p26_p0, %s25_s26), 0  ;;  %s3657_s27 = smov (!%p26_p0, %s28_s27), %s2819_s24 }
   0x7   : > { %p237_p3 = pnand %p2550_p1, %p236_p2  ;;  %p30_p4 = scmp.ge.s32.totalorder %s3657_s27, 2 }
   0x8   : > { %p276_p5 = scmp.lt.s32.totalorder (!%p237_p3), %s2811_s22, 1  ;;  %s2912_s10 = sshll.u32 (!%p237_p3), %s2807_s21, 1 }
   0x9   : > { %s3659_s27 = smov (%p30_p4, %s3657_s27), 0  ;;  %240 = sbr.rel (%p237_p3) target bundleno = 754 (0x2f2), region = 44 }
   0xa   : > { %p289_p6 = scmp.lt.s32.totalorder (!%p237_p3), %s2912_s10, 7  ;;  %s2735_s14 = sshll.u32 (!%p237_p3), %s2807_s21, 4 }
   0xb   : > { %s2736_s18 = sshll.u32 (!%p237_p3), %s2807_s21, 6  ;;  %s2826_s20 = smov (!%p237_p3), 4  }
   0xc   : > { %p2598_p7 = scmp.le.s32.totalorder (!%p237_p3), %s2807_s21, 0 }
   0xe   : > { %v2899_v0 = vld [vmem:[%s3648_s5] sm:$0x1]  ;;  %v2917_v3 = vld [vmem:[%s3647_s4 + $0x8] sm:$0xff]  ;;  %v2922_v4 = vld [vmem:[%s3647_s4 + $0x10] sm:$0xff]  ;;  %vm324_vm0 = vcmask 64512   ;;  %s3661_s22 = smov (!%p276_p5, %s2811_s22), 1 }
   0xf   : > { %v2904_v1 = vld [vmem:[%s3645_s2] sm:$0xff]  ;;  %v2927_v5 = vld [vmem:[%s3647_s4 + $0x18] sm:$0xff]  ;;  %v2939_v7 = vld [vmem:[%s3647_s4 + $0x28] sm:$0xff]  ;;  %vm326_vm1 = vcmask 58368   ;;  %s290_s13 = scalar_select %p289_p6, %s2912_s10, 7  ;;  %v2825_v14 = vmov 0.0  }
  0x10   : > { %v2909_v2 = vld [vmem:[%s3647_s4] sm:$0xff]  ;;  %422 = vmatpush.msra.mxu0 %v2904_v1  ;;  %v2944_v8 = vld [vmem:[%s3647_s4 + $0x30] sm:$0xff]  ;;  %v2949_v9 = vld [vmem:[%s3647_s4 + $0x38] sm:$0xff]  ;;  %s2733_s16 = sshll.u32 %s3661_s22, 6  ;;  %s2734_s17 = sshll.u32 %s3661_s22, 8  ;;  %330 = vst.msk [vmem:[#allocation2 + $0x80] sm:$0xff] %vm324_vm0, %v2825_v14 }
  0x11   : > { %v2934_v6 = vld [vmem:[%s3647_s4 + $0x20] sm:$0xff]  ;;  %v2959_v11 = vld [vmem:[%s3645_s2 + $0x8] sm:$0xff]  ;;  %v2966_v12 = vld [vmem:[%s3645_s2 + $0x10] sm:$0xff]  ;;  %s2977_s29 = scalar_lea.vmem %s3643_s0, %s2733_s16  ;;  %s2982_s8 = scalar_lea.vmem %s3644_s1, %s2734_s17  ;;  %331 = vst.msk [vmem:[#allocation2 + $0x88] sm:$0x3] %vm326_vm1, %v2825_v14  ;;  %vm343_vm2 = vcmask 57344  }
  0x12   : > { %v2954_v10 = vld [vmem:[%s3647_s4 + $0x40] sm:$0xff]  ;;  %509 = vmatpush.msra.mxu1 %v2959_v11  ;;  %v2971_v13 = vld [vmem:[%s3645_s2 + $0x18] sm:$0xff]  ;;  %583 = vmatpush.msra.mxu2 %v2966_v12  ;;  %s2556_s9 = sshll.u32 %s290_s13, 4  ;;  %s2557_s11 = sshll.u32 %s3661_s22, 7  ;;  %332 = vst.msk [vmem:[#allocation2 + $0xc0] sm:$0xff] %vm324_vm0, %v2825_v14  ;;  %vm451_vm3 = vcmask 1041409  }
  0x13   : > { %661 = vmatpush.msra.mxu3 %v2971_v13  ;;  %s293_s12 = sadd.s32 %s2557_s11, %s2556_s9  ;;  %s2993_s16 = scalar_lea.vmem %s2977_s29, %s2735_s14  ;;  %333 = vst.msk [vmem:[#allocation2 + $0xc8] sm:$0x3] %vm326_vm1, %v2825_v14  ;;  %vm454_vm4 = vcmask 1042434   ;;  %vm457_vm5 = vcmask 1043459   ;;  %vm460_vm6 = vcmask 1044484   ;;  %vm463_vm7 = vcmask 1045509  }
  0x14   : > { %s2558_s15 = sshll.u32 %s293_s12, 1  ;;  %v378_v15 = vld [vmem:[%s2993_s16] sm:$0xff]  ;;  %335 = vst.msk [vmem:[#allocation2 + $0x30] sm:$0xff] %vm324_vm0, %v2825_v14  ;;  %s3007_s19 = scalar_lea.vmem %s2982_s8, %s2736_s18  ;;  %vm466_vm8 = vcmask 1046534   ;;  %vm469_vm9 = vcmask 1047559   ;;  %v379_v26 = vld [vmem:[%s2993_s16 + $0x8] sm:$0xff] }
  0x15   : > { %s2998_s22 = scalar_lea.vmem %s3649_s6, %s2558_s15  ;;  %2573 = vmatmul.msk.f32.vlgmr.msra.gmra.mxu0 %vm324_vm0, %v378_v15  ;;  %2575 = vmatmul.msk.f32.vlgmr.msra.gmra.mxu1 %vm324_vm0, %v378_v15  ;;  %336 = vst.msk [vmem:[#allocation2 + $0x38] sm:$0x3] %vm326_vm1, %v2825_v14  ;;  %v389_v16 = vld [vmem:[%s3007_s19 + $0xe] sm:$0x3]  ;;  %v382_v17 = vld [vmem:[%s3007_s19] sm:$0x3] }
  0x16   : > { %2594 = vmatmul.msk.f32.vlgmr.msra.gmra.mxu2 %vm324_vm0, %v378_v15  ;;  %2596 = vmatmul.msk.f32.vlgmr.msra.gmra.mxu3 %vm324_vm0, %v378_v15  ;;  %337 = vst.msk [vmem:[#allocation2 + $0x70] sm:$0xff] %vm324_vm0, %v2825_v14  ;;  %v468_v18 = vrot.slane %v389_v16, 1  ;;  %v383_v19 = vld [vmem:[%s3007_s19 + $0x2] sm:$0x3]  ;;  %v384_v20 = vld [vmem:[%s3007_s19 + $0x4] sm:$0x3] }
  0x17   : > { %338 = vst.msk [vmem:[#allocation2 + $0x78] sm:$0x3] %vm326_vm1, %v2825_v14  ;;  %v385_v21 = vld [vmem:[%s3007_s19 + $0x6] sm:$0x3]  ;;  %v386_v22 = vld [vmem:[%s3007_s19 + $0x8] sm:$0x3] }
  0x18   : > { %534 = vrot.lane.b32.xlu1 %v468_v18, %s2826_s20  ;;  %v387_v23 = vld [vmem:[%s3007_s19 + $0xa] sm:$0x3]  ;;  %v388_v24 = vld [vmem:[%s3007_s19 + $0xc] sm:$0x3]  ;;  %v450_v25 = vrot.slane %v383_v19, 7  ;;  %v453_v27 = vrot.slane %v384_v20, 6 }
  0x19   : > { %v456_v28 = vrot.slane %v385_v21, 5  ;;  %v459_v29 = vrot.slane %v386_v22, 4  ;;  %v462_v31 = vrot.slane %v387_v23, 3  ;;  %v465_v32 = vrot.slane %v388_v24, 2  ;;  %v391_v34 = vld [vmem:[%s3007_s19 + $0x22] sm:$0x3] }
  0x1a   : > { %v452_v30 = vsel %vm451_vm3, %v450_v25, %v382_v17  ;;  %v520_v33 = vsel %vm454_vm4, %v450_v25, %v382_v17  ;;  %v390_v37 = vld [vmem:[%s3007_s19 + $0x20] sm:$0x3]  ;;  %v392_v38 = vld [vmem:[%s3007_s19 + $0x24] sm:$0x3]  ;;  %v393_v39 = vld [vmem:[%s3007_s19 + $0x26] sm:$0x3] }
  0x1b   : > { %v455_v35 = vsel %vm454_vm4, %v453_v27, %v452_v30  ;;  %v521_v36 = vsel %vm457_vm5, %v453_v27, %v520_v33  ;;  %v394_v42 = vld [vmem:[%s3007_s19 + $0x28] sm:$0x3]  ;;  %v3043_v43 = vld [vmem:[%s3007_s19 + $0x2a] sm:$0x3]  ;;  %v3050_v46 = vld [vmem:[%s3007_s19 + $0x2c] sm:$0x3] }
  0x1c   : > { %v458_v40 = vsel %vm457_vm5, %v456_v28, %v455_v35  ;;  %v522_v41 = vsel %vm460_vm6, %v456_v28, %v521_v36  ;;  %v397_v47 = vld [vmem:[%s3007_s19 + $0x2e] sm:$0x3]  ;;  %v471_v50 = vrot.slane %v391_v34, 7  ;;  %v473_v51 = vrot.slane %v392_v38, 6  ;;  %v2586_v52 = vld [vmem:[%s3007_s19 + $0x30] sm:$0x3] }
  0x1d   : > { %2574 = vmatmul.msk.f32.gmra.mxu0 %vm324_vm0, %v379_v26  ;;  %2576 = vmatmul.msk.f32.gmra.mxu1 %vm324_vm0, %v379_v26  ;;  %v461_v44 = vsel %vm460_vm6, %v459_v29, %v458_v40  ;;  %v523_v45 = vsel %vm463_vm7, %v459_v29, %v522_v41  ;;  %v475_v55 = vrot.slane %v393_v39, 5  ;;  %v477_v56 = vrot.slane %v394_v42, 4  ;;  %v2587_v57 = vld [vmem:[%s3007_s19 + $0x32] sm:$0x3]  ;;  %v2588_v62 = vld [vmem:[%s3007_s19 + $0x34] sm:$0x3] }
  0x1e   : > { %2595 = vmatmul.msk.f32.gmra.mxu2 %vm324_vm0, %v379_v26  ;;  %2597 = vmatmul.msk.f32.gmra.mxu3 %vm324_vm0, %v379_v26  ;;  %v464_v48 = vsel %vm463_vm7, %v462_v31, %v461_v44  ;;  %v524_v49 = vsel %vm466_vm8, %v462_v31, %v523_v45  ;;  %v472_v59 = vsel %vm451_vm3, %v471_v50, %v390_v37  ;;  %v479_v60 = vrot.slane %v3043_v43, 3  ;;  %v2589_v16 = vld [vmem:[%s3007_s19 + $0x36] sm:$0x3]  ;;  %v2590_v20 = vld [vmem:[%s3007_s19 + $0x38] sm:$0x3]  ;;  %s2599_s7 = sadd.s32 (!%p2598_p7), 4294967295, %s2912_s10 }
  0x1f   : > { %v467_v53 = vsel %vm466_vm8, %v465_v32, %v464_v48  ;;  %v525_v54 = vsel %vm469_vm9, %v465_v32, %v524_v49  ;;  %v481_v61 = vrot.slane %v3050_v46, 2  ;;  %349 = vst.msk [vmem:[#allocation2 + $0x50] sm:$0x1] %vm343_vm2, %v2825_v14  ;;  %v474_v63 = vsel %vm454_vm4, %v473_v51, %v472_v59  ;;  %v2591_v21 = vld [vmem:[%s3007_s19 + $0x3a] sm:$0x3]  ;;  %s2600_s9 = sshll.u32 (!%p2598_p7), %s2599_s7, 3 }
  0x20   : > { %v470_v58 = vsel %vm469_vm9, %v468_v18, %v467_v53  ;;  %532 = vrot.lane.b32.xlu1 %v525_v54, %s2826_s20  ;;  %v483_v15 = vrot.slane %v397_v47, 1  ;;  %v624_v17 = vrot.slane %v2587_v57, 7  ;;  %v526_v18 = vsel %vm454_vm4, %v471_v50, %v390_v37  ;;  %350 = vst.msk [vmem:[#allocation2 + $0x60] sm:$0x1] %vm343_vm2, %v2825_v14  ;;  %v3081_v24 = vld [vmem:[%s3007_s19 + $0x3c] sm:$0x3]  ;;  %s706_s12 = scalar_lea.vmem (!%p2598_p7), %s2977_s29, %s2600_s9 }
  0x21   : > { %485 = vrot.lane.b32.xlu0 %v470_v58, %s2826_s20  ;;  %v476_v19 = vsel %vm457_vm5, %v475_v55, %v474_v63  ;;  %v527_v22 = vsel %vm457_vm5, %v473_v51, %v526_v18  ;;  %351 = vst.msk [vmem:[#allocation2 + $0x70] sm:$0x1] %vm343_vm2, %v2825_v14  ;;  %v3084_v25 = vld [vmem:[%s3007_s19 + $0x3e] sm:$0x3]  ;;  %v626_v29 = vrot.slane %v2588_v62, 6  ;;  %v628_v30 = vrot.slane %v2589_v16, 5 }
  0x22   : > { %v478_v23 = vsel %vm460_vm6, %v477_v56, %v476_v19  ;;  %v625_v26 = vsel %vm451_vm3, %v624_v17, %v2586_v52  ;;  %538 = vrot.lane.b32.xlu2 %v483_v15, %s2826_s20  ;;  %v678_v27 = vsel %vm454_vm4, %v624_v17, %v2586_v52  ;;  %v630_v31 = vrot.slane %v2590_v20, 4  ;;  %v2579_v38 = vld [vmem:[%s3007_s19 + $0x12] sm:$0x3]  ;;  %v2580_v42 = vld [vmem:[%s3007_s19 + $0x14] sm:$0x3]  ;;  %s2601_s11 = sshll.u32 (!%p2598_p7), %s2599_s7, 5 }
  0x23   : > { %v480_v28 = vsel %vm463_vm7, %v479_v60, %v478_v23  ;;  %v632_v33 = vrot.slane %v2591_v21, 3  ;;  %v634_v34 = vrot.slane %v3081_v24, 2  ;;  %v636_v35 = vrot.slane %v3084_v25, 1  ;;  %v2581_v43 = vld [vmem:[%s3007_s19 + $0x16] sm:$0x3]  ;;  %s3197_s14 = scalar_lea.vmem (!%p2598_p7), %s2982_s8, %s2601_s11  ;;  %s2827_s10 = smov (!%p2598_p7), 4  }
  0x24   : > { %v482_v32 = vsel %vm466_vm8, %v481_v61, %v480_v28  ;;  %v627_v37 = vsel %vm454_vm4, %v626_v29, %v625_v26  ;;  %v679_v39 = vsel %vm457_vm5, %v626_v29, %v678_v27  ;;  %v528_v40 = vsel %vm460_vm6, %v475_v55, %v527_v22  ;;  %356 = vst.msk [vmem:[#allocation2 + $0xc0] sm:$0x1] %vm343_vm2, %v2825_v14  ;;  %v2578_v46 = vld [vmem:[%s3007_s19 + $0x10] sm:$0x3]  ;;  %v2582_v47 = vld [vmem:[%s3007_s19 + $0x18] sm:$0x3] }
  0x25   : > { %v484_v36 = vsel %vm469_vm9, %v483_v15, %v482_v32  ;;  %v629_v41 = vsel %vm457_vm5, %v628_v30, %v627_v37  ;;  %v529_v44 = vsel %vm463_vm7, %v477_v56, %v528_v40  ;;  %v680_v48 = vsel %vm460_vm6, %v628_v30, %v679_v39  ;;  %357 = vst.msk [vmem:[#allocation2 + $0xd0] sm:$0x1] %vm343_vm2, %v2825_v14  ;;  %v2583_v51 = vld [vmem:[%s3007_s19 + $0x1a] sm:$0x3]  ;;  %v2584_v52 = vld [vmem:[%s3007_s19 + $0x1c] sm:$0x3] }
  0x26   : > { %v631_v45 = vsel %vm460_vm6, %v630_v31, %v629_v41  ;;  %v530_v49 = vsel %vm466_vm8, %v479_v60, %v529_v44  ;;  %358 = vst.msk [vmem:[#allocation2 + $0xe0] sm:$0x1] %vm343_vm2, %v2825_v14  ;;  %v610_v55 = vrot.slane %v2579_v38, 7  ;;  %v612_v56 = vrot.slane %v2580_v42, 6  ;;  %v2585_v59 = vld [vmem:[%s3007_s19 + $0x1e] sm:$0x3] }
  0x27   : > { %v633_v50 = vsel %vm463_vm7, %v632_v33, %v631_v45  ;;  %v531_v53 = vsel %vm469_vm9, %v481_v61, %v530_v49  ;;  %v614_v57 = vrot.slane %v2581_v43, 5  ;;  %v616_v60 = vrot.slane %v2582_v47, 4  ;;  %361 = vst.msk [vmem:[#allocation2 + $0x19] sm:$0x1] %vm343_vm2, %v2825_v14 }
  0x28   : > { %v635_v54 = vsel %vm466_vm8, %v634_v34, %v633_v50  ;;  %v681_v62 = vsel %vm463_vm7, %v630_v31, %v680_v48  ;;  %v611_v61 = vsel %vm451_vm3, %v610_v55, %v2578_v46  ;;  %v618_v63 = vrot.slane %v2583_v51, 3  ;;  %362 = vst.msk [vmem:[#allocation2 + $0x29] sm:$0x1] %vm343_vm2, %v2825_v14 }
  0x29   : > { %487 = vrot.lane.b32.xlu0 %v484_v36, %s2826_s20  ;;  %v637_v58 = vsel %vm469_vm9, %v636_v35, %v635_v54  ;;  %v672_v15 = vsel %vm454_vm4, %v610_v55, %v2578_v46  ;;  %v613_v16 = vsel %vm454_vm4, %v612_v56, %v611_v61  ;;  %v620_v17 = vrot.slane %v2584_v52, 2  ;;  %363 = vst.msk [vmem:[#allocation2 + $0x39] sm:$0x1] %vm343_vm2, %v2825_v14 }
  0x2a   : > { %536 = vrot.lane.b32.xlu2 %v531_v53, %s2826_s20  ;;  %640 = vrot.lane.b32.xlu1 %v637_v58, %s2826_s20  ;;  %v673_v18 = vsel %vm457_vm5, %v612_v56, %v672_v15  ;;  %v615_v19 = vsel %vm457_vm5, %v614_v57, %v613_v16  ;;  %v622_v20 = vrot.slane %v2585_v59, 1  ;;  %v682_v21 = vsel %vm466_vm8, %v632_v33, %v681_v62  ;;  %v3159_v33 = vld [vmem:[%s3646_s3] ss:$0 sm:$0xff] }
  0x2b   : > { %v674_v22 = vsel %vm460_vm6, %v614_v57, %v673_v18  ;;  %v617_v23 = vsel %vm460_vm6, %v616_v60, %v615_v19  ;;  %v683_v28 = vsel %vm469_vm9, %v634_v34, %v682_v21  ;;  %368 = vst.msk [vmem:[#allocation2 + $0x89] sm:$0x1] %vm343_vm2, %v2825_v14  ;;  %vm431_vm10 = vcmask 31744  }
  0x2c   : > { %v675_v24 = vsel %vm463_vm7, %v616_v60, %v674_v22  ;;  %v619_v25 = vsel %vm463_vm7, %v618_v63, %v617_v23  ;;  %369 = vst.msk [vmem:[#allocation2 + $0x99] sm:$0x1] %vm343_vm2, %v2825_v14  ;;  %vm491_vm11 = vcmask 64544   ;;  %vm546_vm12 = vcmask 57376  }
  0x2d   : > { %v676_v26 = vsel %vm466_vm8, %v618_v63, %v675_v24  ;;  %v621_v27 = vsel %vm466_vm8, %v620_v17, %v619_v25  ;;  %370 = vst.msk [vmem:[#allocation2 + $0xa9] sm:$0x1] %vm343_vm2, %v2825_v14  ;;  %vm544_vm13 = vcmask 64545  }
  0x2e   : > { %v677_v29 = vsel %vm469_vm9, %v620_v17, %v676_v26  ;;  %v623_v30 = vsel %vm469_vm9, %v622_v20, %v621_v27 }
  0x31   : > { %638 = vrot.lane.b32.xlu0 %v623_v30, %s2826_s20 }
  0x32   : > { %684 = vrot.lane.b32.xlu2 %v677_v29, %s2826_s20  ;;  %688 = vrot.lane.b32.xlu1 %v683_v28, %s2826_s20 }
  0x39   : > { %686 = vrot.lane.b32.xlu0 %v622_v20, %s2826_s20 }
  0x3a   : > { %690 = vrot.lane.b32.xlu2 %v636_v35, %s2826_s20 }
  0x7c   : > { %v539_v31 = vpop.permute.xlu2 %538 }
  0x84   : > { %v537_v34 = vpop.permute.xlu2 %536 }
  0x8a   : > { %v535_v32 = vpop.permute.xlu1 %534 }
  0x8c   : > { %v685_v47 = vpop.permute.xlu2 %684 }
  0x92   : > { %v424_v36 = vpop.f32.mrf.mxu0  ;;  %v511_v37 = vpop.f32.mrf.mxu1 }
  0x93   : > { %v425_v38 = vadd.f32 %v3159_v33, %v424_v36  ;;  %v512_v14 = vadd.f32 %v3159_v33, %v511_v37  ;;  %v486_v39 = vpop.permute.xlu0 %485  ;;  %v533_v35 = vpop.permute.xlu1 %532 }
  0x94   : > { %v691_v55 = vpop.permute.xlu2 %690 }
  0x95   : > { %432 = vst.msk [vmem:[#allocation2 + $0x11] sm:$0xff] %vm431_vm10, %v425_v38 }
  0x96   : > { %492 = vst.msk [vmem:[#allocation2 + $0x11] sm:$0xff] %vm491_vm11, %v486_v39 }
  0x97   : > { %518 = vst.msk [vmem:[#allocation2 + $0x51] sm:$0xff] %vm431_vm10, %v512_v14 }
  0x98   : > { %547 = vst.msk [vmem:[#allocation2 + $0x58] sm:$0x1] %vm546_vm12, %v535_v32 }
  0x99   : > { %545 = vst.msk [vmem:[#allocation2 + $0x50] sm:$0xfe] %vm544_vm13, %v533_v35  ;;  %v585_v40 = vpop.f32.mrf.mxu2  ;;  %v663_v41 = vpop.f32.mrf.mxu3 }
  0x9a   : > { %v586_v42 = vadd.f32 %v3159_v33, %v585_v40  ;;  %v427_v43 = vpop.f32.mrf.mxu0  ;;  %v514_v44 = vpop.f32.mrf.mxu1  ;;  %v664_v49 = vadd.f32 %v3159_v33, %v663_v41 }
  0x9b   : > { %v428_v45 = vadd.f32 %v3159_v33, %v427_v43  ;;  %v515_v46 = vadd.f32 %v3159_v33, %v514_v44  ;;  %v488_v48 = vpop.permute.xlu0 %487 }
  0x9c   : > { %592 = vst.msk [vmem:[#allocation2 + $0x91] sm:$0xff] %vm431_vm10, %v586_v42  ;;  %v641_v50 = vpop.permute.xlu1 %640 }
  0x9d   : > { %433 = vst.msk [vmem:[#allocation2 + $0x21] sm:$0xff] %vm431_vm10, %v428_v45 }
  0x9e   : > { %493 = vst.msk [vmem:[#allocation2 + $0x21] sm:$0xff] %vm491_vm11, %v488_v48 }
  0x9f   : > { %519 = vst.msk [vmem:[#allocation2 + $0x61] sm:$0xff] %vm431_vm10, %v515_v46 }
  0xa0   : > { %548 = vst.msk [vmem:[#allocation2 + $0x60] sm:$0xfe] %vm544_vm13, %v537_v34 }
  0xa1   : > { %549 = vst.msk [vmem:[#allocation2 + $0x68] sm:$0x1] %vm546_vm12, %v539_v31  ;;  %v588_v51 = vpop.f32.mrf.mxu2  ;;  %v666_v52 = vpop.f32.mrf.mxu3 }
  0xa2   : > { %670 = vst.msk [vmem:[#allocation2 + $0xd1] sm:$0xff] %vm431_vm10, %v664_v49  ;;  %v589_v53 = vadd.f32 %v3159_v33, %v588_v51  ;;  %v667_v54 = vadd.f32 %v3159_v33, %v666_v52 }
  0xa3   : > { %696 = vst.msk [vmem:[#allocation2 + $0xd0] sm:$0xfe] %vm544_vm13, %v685_v47  ;;  %v639_v56 = vpop.permute.xlu0 %638 }
  0xa4   : > { %593 = vst.msk [vmem:[#allocation2 + $0xa1] sm:$0xff] %vm431_vm10, %v589_v53  ;;  %v689_v57 = vpop.permute.xlu1 %688 }
  0xa5   : > { %645 = vst.msk [vmem:[#allocation2 + $0xa1] sm:$0xff] %vm491_vm11, %v641_v50 }
  0xa6   : > { %671 = vst.msk [vmem:[#allocation2 + $0xe1] sm:$0xff] %vm431_vm10, %v667_v54 }
  0xa7   : > { %644 = vst.msk [vmem:[#allocation2 + $0x91] sm:$0xff] %vm491_vm11, %v639_v56 }
  0xa8   : > { %699 = vst.msk [vmem:[#allocation2 + $0xe8] sm:$0x1] %vm546_vm12, %v691_v55  ;;  %703 = sbr.rel (%p2598_p7) target bundleno = 315 (0x13b), region = 48 }
  0xa9   : > { %698 = vst.msk [vmem:[#allocation2 + $0xe0] sm:$0xfe] %vm544_vm13, %v689_v57 }
  0xab   : > { %v687_v58 = vpop.permute.xlu0 %686 }
  0xac   : > { %697 = vst.msk [vmem:[#allocation2 + $0xd8] sm:$0x1] %vm546_vm12, %v687_v58 }
  0xad   : > { %736 = vmatpush.msra.mxu0 %v2904_v1  ;;  %783 = vmatpush.msra.mxu1 %v2959_v11  ;;  %v707_v59 = vld [vmem:[%s706_s12] sm:$0xff]  ;;  %v717_v60 = vld [vmem:[%s3197_s14 + $0xe] sm:$0x3]  ;;  %v714_v17 = vld [vmem:[%s3197_s14 + $0x8] sm:$0x3] }
  0xae   : > { %829 = vmatpush.msra.mxu2 %v2966_v12  ;;  %877 = vmatpush.msra.mxu3 %v2971_v13  ;;  %v710_v62 = vld [vmem:[%s3197_s14] sm:$0x3]  ;;  %v762_v61 = vrot.slane %v717_v60, 1  ;;  %v711_v63 = vld [vmem:[%s3197_s14 + $0x2] sm:$0x3]  ;;  %v756_v23 = vrot.slane %v714_v17, 4 }
  0xaf   : > { %2602 = vmatmul.msk.f32.vlgmr.msra.gmra.mxu0 %vm324_vm0, %v707_v59  ;;  %2603 = vmatmul.msk.f32.vlgmr.msra.gmra.mxu1 %vm324_vm0, %v707_v59  ;;  %v712_v15 = vld [vmem:[%s3197_s14 + $0x4] sm:$0x3]  ;;  %v713_v16 = vld [vmem:[%s3197_s14 + $0x6] sm:$0x3]  ;;  %v715_v18 = vld [vmem:[%s3197_s14 + $0xa] sm:$0x3] }
  0xb0   : > { %2613 = vmatmul.msk.f32.vlgmr.msra.gmra.mxu2 %vm324_vm0, %v707_v59  ;;  %2614 = vmatmul.msk.f32.vlgmr.msra.gmra.mxu3 %vm324_vm0, %v707_v59  ;;  %v716_v19 = vld [vmem:[%s3197_s14 + $0xc] sm:$0x3]  ;;  %v750_v20 = vrot.slane %v711_v63, 7  ;;  %v752_v21 = vrot.slane %v712_v15, 6  ;;  %v754_v22 = vrot.slane %v713_v16, 5  ;;  %v758_v24 = vrot.slane %v715_v18, 3 }
  0xb1   : > { %798 = vrot.lane.b32.xlu1 %v762_v61, %s2827_s10  ;;  %v760_v25 = vrot.slane %v716_v19, 2  ;;  %v2606_v26 = vld [vmem:[%s3197_s14 + $0x12] sm:$0x3]  ;;  %v2607_v28 = vld [vmem:[%s3197_s14 + $0x14] sm:$0x3] }
  0xb2   : > { %v751_v27 = vsel %vm451_vm3, %v750_v20, %v710_v62  ;;  %v2608_v29 = vld [vmem:[%s3197_s14 + $0x16] sm:$0x3]  ;;  %v2609_v30 = vld [vmem:[%s3197_s14 + $0x18] sm:$0x3]  ;;  %v790_v31 = vsel %vm454_vm4, %v750_v20, %v710_v62  ;;  %v2605_v34 = vld [vmem:[%s3197_s14 + $0x10] sm:$0x3] }
  0xb3   : > { %v753_v32 = vsel %vm454_vm4, %v752_v21, %v751_v27  ;;  %v2610_v36 = vld [vmem:[%s3197_s14 + $0x1a] sm:$0x3]  ;;  %v2611_v37 = vld [vmem:[%s3197_s14 + $0x1c] sm:$0x3]  ;;  %v791_v38 = vsel %vm457_vm5, %v752_v21, %v790_v31  ;;  %v2612_v39 = vld [vmem:[%s3197_s14 + $0x1e] sm:$0x3] }
  0xb4   : > { %v755_v14 = vsel %vm457_vm5, %v754_v22, %v753_v32  ;;  %v844_v35 = vrot.slane %v2606_v26, 7  ;;  %v846_v40 = vrot.slane %v2607_v28, 6  ;;  %v848_v41 = vrot.slane %v2608_v29, 5 }
  0xb5   : > { %v757_v42 = vsel %vm460_vm6, %v756_v23, %v755_v14  ;;  %v850_v43 = vrot.slane %v2609_v30, 4  ;;  %v852_v44 = vrot.slane %v2610_v36, 3  ;;  %v854_v47 = vrot.slane %v2611_v37, 2 }
  0xb6   : > { %v759_v45 = vsel %vm463_vm7, %v758_v24, %v757_v42  ;;  %v845_v46 = vsel %vm451_vm3, %v844_v35, %v2605_v34  ;;  %v792_v48 = vsel %vm460_vm6, %v754_v22, %v791_v38  ;;  %v856_v51 = vrot.slane %v2612_v39, 1 }
  0xb7   : > { %v761_v49 = vsel %vm466_vm8, %v760_v25, %v759_v45  ;;  %v847_v50 = vsel %vm454_vm4, %v846_v40, %v845_v46  ;;  %v884_v52 = vsel %vm454_vm4, %v844_v35, %v2605_v34  ;;  %v793_v55 = vsel %vm463_vm7, %v756_v23, %v792_v48 }
  0xb8   : > { %v763_v53 = vsel %vm469_vm9, %v762_v61, %v761_v49  ;;  %v849_v54 = vsel %vm457_vm5, %v848_v41, %v847_v50  ;;  %v885_v56 = vsel %vm457_vm5, %v846_v40, %v884_v52  ;;  %v794_v61 = vsel %vm466_vm8, %v758_v24, %v793_v55 }
  0xb9   : > { %764 = vrot.lane.b32.xlu0 %v763_v53, %s2827_s10  ;;  %v851_v57 = vsel %vm460_vm6, %v850_v43, %v849_v54  ;;  %v886_v58 = vsel %vm460_vm6, %v848_v41, %v885_v56  ;;  %v795_v17 = vsel %vm469_vm9, %v760_v25, %v794_v61 }
  0xba   : > { %v853_v59 = vsel %vm463_vm7, %v852_v44, %v851_v57  ;;  %v887_v60 = vsel %vm463_vm7, %v850_v43, %v886_v58 }
  0xbb   : > { %v855_v62 = vsel %vm466_vm8, %v854_v47, %v853_v59  ;;  %v888_v63 = vsel %vm466_vm8, %v852_v44, %v887_v60 }
  0xbc   : > { %v857_v15 = vsel %vm469_vm9, %v856_v51, %v855_v62  ;;  %v889_v16 = vsel %vm469_vm9, %v854_v47, %v888_v63 }
  0xbd   : > { %858 = vrot.lane.b32.xlu1 %v857_v15, %s2827_s10  ;;  %890 = vrot.lane.b32.xlu2 %v889_v16, %s2827_s10 }
  0xc1   : > { %796 = vrot.lane.b32.xlu0 %v795_v17, %s2827_s10 }
  0xc5   : > { %892 = vrot.lane.b32.xlu2 %v856_v51, %s2827_s10 }
 0x117   : > { %v891_v18 = vpop.permute.xlu2 %890 }
 0x11f   : > { %v893_v28 = vpop.permute.xlu2 %892 }
 0x123   : > { %v799_v21 = vpop.permute.xlu1 %798 }
 0x12b   : > { %v765_v22 = vpop.permute.xlu0 %764 }
 0x12c   : > { %v738_v19 = vpop.f32.mrf.mxu0  ;;  %v785_v20 = vpop.f32.mrf.mxu1 }
 0x12f   : > { %v859_v25 = vpop.permute.xlu1 %858 }
 0x133   : > { %v831_v23 = vpop.f32.mrf.mxu2  ;;  %v879_v24 = vpop.f32.mrf.mxu3 }
 0x134   : > { %v832_v26 = vadd.f32 %v3159_v33, %v831_v23  ;;  %v880_v27 = vadd.f32 %v3159_v33, %v879_v24  ;;  %v797_v29 = vpop.permute.xlu0 %796 }
 0x136   : > { %835 = vst.msk [vmem:[#allocation2 + $0x81] sm:$0xff] %vm431_vm10, %v832_v26 }
 0x137   : > { %883 = vst.msk [vmem:[#allocation2 + $0xc1] sm:$0xff] %vm431_vm10, %v880_v27 }
 0x138   : > { %896 = vst.msk [vmem:[#allocation2 + $0xc0] sm:$0xfe] %vm544_vm13, %v891_v18 }
 0x139   : > { %897 = vst.msk [vmem:[#allocation2 + $0xc8] sm:$0x1] %vm546_vm12, %v893_v28 }
 0x13a   : > { %861 = vst.msk [vmem:[#allocation2 + $0x81] sm:$0xff] %vm491_vm11, %v859_v25 }
 0x13b PF: > { %p2615_p8 = scmp.ge.s32.totalorder %s2807_s21, 3 }
 0x13c   : > { %s2828_s21 = smov (!%p2615_p8), 4  }
 0x13d   : > { %901 = sbr.rel (%p2615_p8) target bundleno = 459 (0x1cb), region = 52 }
 0x142   : > { %934 = vmatpush.msra.mxu0 %v2904_v1  ;;  %981 = vmatpush.msra.mxu1 %v2959_v11  ;;  %v2618_v30 = vld [vmem:[%s2993_s16 + $0x10] sm:$0xff]  ;;  %v2628_v31 = vld [vmem:[%s3007_s19 + $0x4e] sm:$0x3]  ;;  %v2621_v32 = vld [vmem:[%s3007_s19 + $0x40] sm:$0x3] }
 0x143   : > { %1027 = vmatpush.msra.mxu2 %v2966_v12  ;;  %1075 = vmatpush.msra.mxu3 %v2971_v13  ;;  %v960_v34 = vrot.slane %v2628_v31, 1  ;;  %v2622_v36 = vld [vmem:[%s3007_s19 + $0x42] sm:$0x3]  ;;  %v2623_v37 = vld [vmem:[%s3007_s19 + $0x44] sm:$0x3] }
 0x144   : > { %2629 = vmatmul.msk.f32.vlgmr.msra.gmra.mxu0 %vm324_vm0, %v2618_v30  ;;  %2630 = vmatmul.msk.f32.vlgmr.msra.gmra.mxu1 %vm324_vm0, %v2618_v30  ;;  %v2624_v38 = vld [vmem:[%s3007_s19 + $0x46] sm:$0x3]  ;;  %v2625_v1 = vld [vmem:[%s3007_s19 + $0x48] sm:$0x3]  ;;  %v2626_v11 = vld [vmem:[%s3007_s19 + $0x4a] sm:$0x3] }
 0x145   : > { %2641 = vmatmul.msk.f32.vlgmr.msra.gmra.mxu2 %vm324_vm0, %v2618_v30  ;;  %2642 = vmatmul.msk.f32.vlgmr.msra.gmra.mxu3 %vm324_vm0, %v2618_v30  ;;  %v2627_v12 = vld [vmem:[%s3007_s19 + $0x4c] sm:$0x3]  ;;  %v948_v13 = vrot.slane %v2622_v36, 7  ;;  %v950_v14 = vrot.slane %v2623_v37, 6  ;;  %v952_v39 = vrot.slane %v2624_v38, 5  ;;  %v954_v35 = vrot.slane %v2625_v1, 4 }
 0x146   : > { %996 = vrot.lane.b32.xlu1 %v960_v34, %s2828_s21  ;;  %v956_v40 = vrot.slane %v2626_v11, 3  ;;  %v958_v41 = vrot.slane %v2627_v12, 2  ;;  %v2634_v42 = vld [vmem:[%s3007_s19 + $0x52] sm:$0x3]  ;;  %v2635_v44 = vld [vmem:[%s3007_s19 + $0x54] sm:$0x3] }
 0x147   : > { %v949_v43 = vsel %vm451_vm3, %v948_v13, %v2621_v32  ;;  %v2636_v45 = vld [vmem:[%s3007_s19 + $0x56] sm:$0x3]  ;;  %v2637_v46 = vld [vmem:[%s3007_s19 + $0x58] sm:$0x3]  ;;  %v988_v47 = vsel %vm454_vm4, %v948_v13, %v2621_v32  ;;  %v2633_v49 = vld [vmem:[%s3007_s19 + $0x50] sm:$0x3] }
 0x148   : > { %v951_v48 = vsel %vm454_vm4, %v950_v14, %v949_v43  ;;  %v2638_v50 = vld [vmem:[%s3007_s19 + $0x5a] sm:$0x3]  ;;  %v2639_v51 = vld [vmem:[%s3007_s19 + $0x5c] sm:$0x3]  ;;  %v989_v52 = vsel %vm457_vm5, %v950_v14, %v988_v47  ;;  %v2640_v54 = vld [vmem:[%s3007_s19 + $0x5e] sm:$0x3] }
 0x149   : > { %v953_v53 = vsel %vm457_vm5, %v952_v39, %v951_v48  ;;  %v1042_v55 = vrot.slane %v2634_v42, 7  ;;  %v1044_v56 = vrot.slane %v2635_v44, 6  ;;  %v1046_v57 = vrot.slane %v2636_v45, 5 }
 0x14a   : > { %v955_v58 = vsel %vm460_vm6, %v954_v35, %v953_v53  ;;  %v1048_v59 = vrot.slane %v2637_v46, 4  ;;  %v1050_v60 = vrot.slane %v2638_v50, 3  ;;  %v1052_v63 = vrot.slane %v2639_v51, 2 }
 0x14b   : > { %v957_v62 = vsel %vm463_vm7, %v956_v40, %v955_v58  ;;  %v1043_v61 = vsel %vm451_vm3, %v1042_v55, %v2633_v49  ;;  %v990_v15 = vsel %vm460_vm6, %v952_v39, %v989_v52  ;;  %v1054_v18 = vrot.slane %v2640_v54, 1 }
 0x14c   : > { %v959_v16 = vsel %vm466_vm8, %v958_v41, %v957_v62  ;;  %v1045_v17 = vsel %vm454_vm4, %v1044_v56, %v1043_v61  ;;  %v1082_v19 = vsel %vm454_vm4, %v1042_v55, %v2633_v49  ;;  %v991_v22 = vsel %vm463_vm7, %v954_v35, %v990_v15 }
 0x14d   : > { %v961_v20 = vsel %vm469_vm9, %v960_v34, %v959_v16  ;;  %v1047_v21 = vsel %vm457_vm5, %v1046_v57, %v1045_v17  ;;  %v1083_v23 = vsel %vm457_vm5, %v1044_v56, %v1082_v19  ;;  %v992_v29 = vsel %vm466_vm8, %v956_v40, %v991_v22 }
 0x14e   : > { %962 = vrot.lane.b32.xlu0 %v961_v20, %s2828_s21  ;;  %v1049_v24 = vsel %vm460_vm6, %v1048_v59, %v1047_v21  ;;  %v1084_v26 = vsel %vm460_vm6, %v1046_v57, %v1083_v23  ;;  %v993_v34 = vsel %vm469_vm9, %v958_v41, %v992_v29 }
 0x14f   : > { %v1051_v27 = vsel %vm463_vm7, %v1050_v60, %v1049_v24  ;;  %v1085_v28 = vsel %vm463_vm7, %v1048_v59, %v1084_v26 }
 0x150   : > { %v1053_v25 = vsel %vm466_vm8, %v1052_v63, %v1051_v27  ;;  %v1086_v30 = vsel %vm466_vm8, %v1050_v60, %v1085_v28 }
 0x151   : > { %v1055_v31 = vsel %vm469_vm9, %v1054_v18, %v1053_v25  ;;  %v1087_v32 = vsel %vm469_vm9, %v1052_v63, %v1086_v30 }
 0x152   : > { %1056 = vrot.lane.b32.xlu1 %v1055_v31, %s2828_s21  ;;  %1088 = vrot.lane.b32.xlu2 %v1087_v32, %s2828_s21 }
 0x156   : > { %994 = vrot.lane.b32.xlu0 %v993_v34, %s2828_s21 }
 0x15a   : > { %1090 = vrot.lane.b32.xlu2 %v1054_v18, %s2828_s21 }
 0x1ac   : > { %v1089_v36 = vpop.permute.xlu2 %1088 }
 0x1b4   : > { %v1091_v40 = vpop.permute.xlu2 %1090 }
 0x1b8   : > { %v997_v13 = vpop.permute.xlu1 %996 }
 0x1c0   : > { %v963_v37 = vpop.permute.xlu0 %962 }
 0x1c1   : > { %v936_v38 = vpop.f32.mrf.mxu0  ;;  %v983_v1 = vpop.f32.mrf.mxu1 }
 0x1c2   : > { %v937_v11 = vadd.f32 %v3159_v33, %v936_v38  ;;  %v984_v12 = vadd.f32 %v3159_v33, %v983_v1 }
 0x1c4   : > { %939 = vst.msk [vmem:[#allocation2 + $0x31] sm:$0xff] %vm431_vm10, %v937_v11  ;;  %v1057_v41 = vpop.permute.xlu1 %1056 }
 0x1c5   : > { %987 = vst.msk [vmem:[#allocation2 + $0x71] sm:$0xff] %vm431_vm10, %v984_v12 }
 0x1c6   : > { %1001 = vst.msk [vmem:[#allocation2 + $0x78] sm:$0x1] %vm546_vm12, %v997_v13 }
 0x1c7   : > { %965 = vst.msk [vmem:[#allocation2 + $0x31] sm:$0xff] %vm491_vm11, %v963_v37 }
 0x1c8   : > { %v1029_v14 = vpop.f32.mrf.mxu2  ;;  %v1077_v39 = vpop.f32.mrf.mxu3 }
 0x1c9   : > { %v995_v35 = vpop.permute.xlu0 %994 }
 0x1ca   : > { %1000 = vst.msk [vmem:[#allocation2 + $0x70] sm:$0xfe] %vm544_vm13, %v995_v35 }
 0x1cb PF: > { %1123 = vmatpush.msra.mxu0 %v2917_v3  ;;  %1183 = vmatpush.msra.mxu2 %v2922_v4  ;;  %v1100_v33 = vld [vmem:[#allocation2 + $0x81] sm:$0xff]  ;;  %v3325_v43 = vld [vmem:[#allocation2 + $0x50] sm:$0xff]  ;;  %vm1725_vm14 = vcmask 1040384   ;;  %vm1742_vm15 = vcmask 25600  }
 0x1cc   : > { %v1160_v42 = vld [vmem:[#allocation2 + $0xc1] sm:$0xff]  ;;  %1216 = vmatpush.msra.mxu3 %v2927_v5  ;;  %2643 = vmatmul.msk.f32.vlgmr.msra.gmra.mxu0 %vm324_vm0, %v1100_v33  ;;  %v3338_v45 = vld [vmem:[#allocation2 + $0x91] sm:$0xff] }
 0x1cd   : > { %v1097_v44 = vld [vmem:[#allocation2 + $0xc0] sm:$0xff]  ;;  %2647 = vmatmul.msk.f32.vlgmr.msra.gmra.mxu2 %vm324_vm0, %v1160_v42  ;;  %2649 = vmatmul.msk.f32.vlgmr.msra.gmra.mxu3 %vm324_vm0, %v3325_v43  ;;  %v3342_v46 = vld [vmem:[#allocation2 + $0xd1] sm:$0xff] }
 0x1ce   : > { %1315 = vmatpush.msrb.mxu2 %v2944_v8  ;;  %1152 = vmatpush.msra.mxu1 %v2909_v2  ;;  %v3344_v47 = vld [vmem:[#allocation2 + $0x60] sm:$0xff]  ;;  %v3350_v48 = vld [vmem:[#allocation2 + $0xd0] sm:$0xff] }
 0x1cf   : > { %2645 = vmatmul.msk.f32.vlgmr.msra.gmra.mxu1 %vm324_vm0, %v1097_v44  ;;  %1249 = vmatpush.msrb.mxu0 %v2934_v6  ;;  %v3358_v49 = vld [vmem:[#allocation2 + $0x11] sm:$0xff]  ;;  %v3374_v51 = vld [vmem:[#allocation2 + $0x21] sm:$0xff] }
 0x1d0   : > { %1348 = vmatpush.msrb.mxu3 %v2949_v9  ;;  %1282 = vmatpush.msrb.mxu1 %v2939_v7  ;;  %v3362_v50 = vld [vmem:[#allocation2 + $0x51] sm:$0xff]  ;;  %v1293_v52 = vld [vmem:[#allocation2 + $0xe0] sm:$0xff] }
 0x1d1   : > { %1436 = vmatpush.msra.mxu2 %v2909_v2  ;;  %1381 = vmatpush.msra.mxu0 %v2954_v10  ;;  %v3376_v53 = vld [vmem:[#allocation2 + $0xa1] sm:$0xff]  ;;  %v3398_v57 = vld [vmem:[#allocation2 + $0x92] sm:$0xff] }
 0x1d2   : > { %1467 = vmatpush.msra.mxu3 %v2922_v4  ;;  %1413 = vmatpush.msra.mxu1 %v2917_v3  ;;  %v3380_v54 = vld [vmem:[#allocation2 + $0x61] sm:$0xff]  ;;  %v1527_v58 = vld [vmem:[#allocation2 + $0x12] sm:$0xff] }
 0x1d3   : > { %v1444_v55 = vld [vmem:[#allocation2 + $0x82] sm:$0xff] }
 0x1d4   : > { %2644 = vmatmul.msk.f32.gmra.mxu0 %vm324_vm0, %v3338_v45  ;;  %v3396_v56 = vld [vmem:[#allocation2 + $0xe1] sm:$0xff] }
 0x1d5   : > { %2648 = vmatmul.msk.f32.gmra.mxu2 %vm324_vm0, %v3342_v46  ;;  %2650 = vmatmul.msk.f32.gmra.mxu3 %vm324_vm0, %v3344_v47  ;;  %v1528_v59 = vld [vmem:[#allocation2 + $0x22] sm:$0xff] }
 0x1d6   : > { %v1611_v60 = vld [vmem:[#allocation2 + $0xa2] sm:$0xff] }
 0x1d7   : > { %2646 = vmatmul.msk.f32.gmra.mxu1 %vm324_vm0, %v3350_v48 }
 0x1dc   : > { %2651 = vmatmul.msk.f32.vlgmr.msrb.gmra.mxu0 %vm324_vm0, %v3358_v49 }
 0x1dd   : > { %2655 = vmatmul.msk.f32.vlgmr.msrb.gmra.mxu2 %vm324_vm0, %v3350_v48  ;;  %2657 = vmatmul.msk.f32.vlgmr.msrb.gmra.mxu3 %vm324_vm0, %v3338_v45 }
 0x1de   : > { %1550 = vmatpush.msrb.mxu2 %v2939_v7  ;;  %1492 = vmatpush.msrb.mxu0 %v2927_v5 }
 0x1df   : > { %2653 = vmatmul.msk.f32.vlgmr.msrb.gmra.mxu1 %vm324_vm0, %v3362_v50  ;;  %1575 = vmatpush.msrb.mxu3 %v2944_v8 }
 0x1e0   : > { %1517 = vmatpush.msrb.mxu1 %v2934_v6 }
 0x1e4   : > { %2652 = vmatmul.msk.f32.gmra.mxu0 %vm324_vm0, %v3374_v51 }
 0x1e5   : > { %2656 = vmatmul.msk.f32.gmra.mxu2 %vm324_vm0, %v1293_v52  ;;  %2658 = vmatmul.msk.f32.gmra.mxu3 %vm324_vm0, %v3376_v53 }
 0x1e7   : > { %2654 = vmatmul.msk.f32.gmra.mxu1 %vm324_vm0, %v3380_v54 }
 0x1ec   : > { %2659 = vmatmul.msk.f32.vlgmr.msra.gmra.mxu0 %vm324_vm0, %v3342_v46 }
 0x1ed   : > { %2663 = vmatmul.msk.f32.vlgmr.msra.gmra.mxu2 %vm324_vm0, %v1100_v33  ;;  %2665 = vmatmul.msk.f32.vlgmr.msra.gmra.mxu3 %vm324_vm0, %v1444_v55 }
 0x1ee   : > { %1784 = vmatpush.msra.mxu2 %v2917_v3  ;;  %1600 = vmatpush.msra.mxu0 %v2949_v9 }
 0x1ef   : > { %2661 = vmatmul.msk.f32.vlgmr.msra.gmra.mxu1 %vm324_vm0, %v1160_v42  ;;  %1813 = vmatpush.msra.mxu3 %v2909_v2 }
 0x1f0   : > { %1633 = vmatpush.msra.mxu1 %v2954_v10 }
 0x1f4   : > { %2660 = vmatmul.msk.f32.gmra.mxu0 %vm324_vm0, %v3396_v56 }
 0x1f5   : > { %2664 = vmatmul.msk.f32.gmra.mxu2 %vm324_vm0, %v3338_v45  ;;  %2666 = vmatmul.msk.f32.gmra.mxu3 %vm324_vm0, %v3398_v57 }
 0x1f7   : > { %2662 = vmatmul.msk.f32.gmra.mxu1 %vm324_vm0, %v3342_v46 }
 0x1fc   : > { %2667 = vmatmul.msk.f32.vlgmr.msrb.gmra.mxu0 %vm324_vm0, %v3358_v49 }
 0x1fd   : > { %2671 = vmatmul.msk.f32.vlgmr.msrb.gmra.mxu2 %vm324_vm0, %v1527_v58  ;;  %2673 = vmatmul.msk.f32.vlgmr.msrb.gmra.mxu3 %vm324_vm0, %v3338_v45 }
 0x1fe   : > { %1910 = vmatpush.msrb.mxu2 %v2934_v6  ;;  %1844 = vmatpush.msrb.mxu0 %v2922_v4 }
 0x1ff   : > { %2669 = vmatmul.msk.f32.vlgmr.msrb.gmra.mxu1 %vm324_vm0, %v3362_v50  ;;  %1943 = vmatpush.msrb.mxu3 %v2939_v7 }
 0x200   : > { %1877 = vmatpush.msrb.mxu1 %v2927_v5 }
 0x204   : > { %2668 = vmatmul.msk.f32.gmra.mxu0 %vm324_vm0, %v3374_v51 }
 0x205   : > { %2672 = vmatmul.msk.f32.gmra.mxu2 %vm324_vm0, %v1528_v59  ;;  %2674 = vmatmul.msk.f32.gmra.mxu3 %vm324_vm0, %v3376_v53 }
 0x207   : > { %2670 = vmatmul.msk.f32.gmra.mxu1 %vm324_vm0, %v3380_v54 }
 0x20c   : > { %2675 = vmatmul.msk.f32.vlgmr.msra.gmra.mxu0 %vm324_vm0, %v3342_v46 }
 0x20d   : > { %2679 = vmatmul.msk.f32.vlgmr.msra.gmra.mxu2 %vm324_vm0, %v3358_v49  ;;  %2681 = vmatmul.msk.f32.vlgmr.msra.gmra.mxu3 %vm324_vm0, %v3325_v43 }
 0x20e   : > { %2044 = vmatpush.msra.mxu2 %v2954_v10  ;;  %1977 = vmatpush.msra.mxu0 %v2944_v8 }
 0x20f   : > { %2677 = vmatmul.msk.f32.vlgmr.msra.gmra.mxu1 %vm324_vm0, %v3398_v57  ;;  %2073 = vmatpush.msra.mxu3 %v2917_v3  ;;  %v2022_v3 = vld [vmem:[#allocation2 + $0x71] sm:$0xff] }
 0x210   : > { %2011 = vmatpush.msra.mxu1 %v2949_v9 }
 0x214   : > { %2676 = vmatmul.msk.f32.gmra.mxu0 %vm324_vm0, %v3396_v56 }
 0x215   : > { %2680 = vmatmul.msk.f32.gmra.mxu2 %vm324_vm0, %v3374_v51  ;;  %2682 = vmatmul.msk.f32.gmra.mxu3 %vm324_vm0, %v3344_v47 }
 0x217   : > { %2678 = vmatmul.msk.f32.gmra.mxu1 %vm324_vm0, %v1611_v60 }
 0x21c   : > { %2683 = vmatmul.msk.f32.vlgmr.msrb.gmra.mxu0 %vm324_vm0, %v3362_v50 }
 0x21d   : > { %2687 = vmatmul.msk.f32.vlgmr.msrb.gmra.mxu2 %vm324_vm0, %v3338_v45  ;;  %2689 = vmatmul.msk.f32.vlgmr.msrb.gmra.mxu3 %vm324_vm0, %v3342_v46 }
 0x21e   : > { %2152 = vmatpush.msrb.mxu2 %v2927_v5  ;;  %2096 = vmatpush.msrb.mxu0 %v2909_v2  ;;  %v1955_v2 = vld [vmem:[#allocation2 + $0x70] sm:$0xff] }
 0x21f   : > { %2685 = vmatmul.msk.f32.vlgmr.msrb.gmra.mxu1 %vm324_vm0, %v3350_v48  ;;  %2177 = vmatpush.msrb.mxu3 %v2934_v6  ;;  %v3507_v48 = vperm.slane %v2899_v0, 0 }
 0x220   : > { %2127 = vmatpush.msrb.mxu1 %v2922_v4  ;;  %v1989_v4 = vld [vmem:[#allocation2 + $0x31] sm:$0xff] }
 0x224   : > { %2684 = vmatmul.msk.f32.gmra.mxu0 %vm324_vm0, %v3380_v54 }
 0x225   : > { %2688 = vmatmul.msk.f32.gmra.mxu2 %vm324_vm0, %v3376_v53  ;;  %2690 = vmatmul.msk.f32.gmra.mxu3 %vm324_vm0, %v3396_v56 }
 0x227   : > { %2686 = vmatmul.msk.f32.gmra.mxu1 %vm324_vm0, %v1293_v52 }
 0x22c   : > { %2691 = vmatmul.msk.f32.vlgmr.msra.gmra.mxu0 %vm324_vm0, %v3344_v47 }
 0x22d   : > { %2695 = vmatmul.msk.f32.vlgmr.msra.gmra.mxu2 %vm324_vm0, %v3380_v54  ;;  %2697 = vmatmul.msk.f32.vlgmr.msra.gmra.mxu3 %vm324_vm0, %v3362_v50 }
 0x22e   : > { %2260 = vmatpush.msra.mxu2 %v2949_v9  ;;  %2210 = vmatpush.msra.mxu0 %v2939_v7 }
 0x22f   : > { %2693 = vmatmul.msk.f32.vlgmr.msra.gmra.mxu1 %vm324_vm0, %v3374_v51  ;;  %2293 = vmatpush.msra.mxu3 %v2954_v10  ;;  %v2271_v10 = vld [vmem:[#allocation2 + $0x32] sm:$0xff] }
 0x230   : > { %2235 = vmatpush.msra.mxu1 %v2944_v8 }
 0x234   : > { %2692 = vmatmul.msk.f32.gmra.mxu0 %vm324_vm0, %v1955_v2 }
 0x235   : > { %2696 = vmatmul.msk.f32.gmra.mxu2 %vm324_vm0, %v2022_v3  ;;  %2698 = vmatmul.msk.f32.gmra.mxu3 %vm324_vm0, %v3380_v54 }
 0x237   : > { %2694 = vmatmul.msk.f32.gmra.mxu1 %vm324_vm0, %v1989_v4 }
 0x23c   : > { %2699 = vmatmul.msk.f32.vlgmr.msrb.gmra.mxu0 %vm324_vm0, %v3358_v49 }
 0x23d   : > { %2703 = vmatmul.msk.f32.vlgmr.msrb.gmra.mxu2 %vm324_vm0, %v3338_v45  ;;  %2705 = vmatmul.msk.f32.vlgmr.msrb.gmra.mxu3 %vm324_vm0, %v3342_v46 }
 0x23f   : > { %2701 = vmatmul.msk.f32.vlgmr.msrb.gmra.mxu1 %vm324_vm0, %v1527_v58 }
 0x244   : > { %2700 = vmatmul.msk.f32.gmra.mxu0 %vm324_vm0, %v3374_v51 }
 0x245   : > { %2704 = vmatmul.msk.f32.gmra.mxu2 %vm324_vm0, %v3376_v53  ;;  %2706 = vmatmul.msk.f32.gmra.mxu3 %vm324_vm0, %v3396_v56 }
 0x247   : > { %2702 = vmatmul.msk.f32.gmra.mxu1 %vm324_vm0, %v1528_v59 }
 0x249   : > { %v1125_v5 = vpop.f32.mrf.mxu0 }
 0x24c   : > { %v1154_v6 = vpop.f32.mrf.mxu1  ;;  %2707 = vmatmul.msk.f32.vlgmr.msra.gmra.mxu0 %vm324_vm0, %v3398_v57 }
 0x24d   : > { %2711 = vmatmul.msk.f32.vlgmr.msra.gmra.mxu2 %vm324_vm0, %v3380_v54  ;;  %2713 = vmatmul.msk.f32.vlgmr.msra.gmra.mxu3 %vm324_vm0, %v1528_v59  ;;  %v1155_v26 = vadd.f32 %v1154_v6, %v1125_v5 }
 0x24f   : > { %2709 = vmatmul.msk.f32.vlgmr.msra.gmra.mxu1 %vm324_vm0, %v3374_v51 }
 0x250   : > { %v1185_v7 = vpop.f32.mrf.mxu2  ;;  %v1218_v8 = vpop.f32.mrf.mxu3 }
 0x251   : > { %v1128_v9 = vpop.f32.mrf.mxu0  ;;  %v1191_v29 = vadd.f32 %v1185_v7, %v1155_v26 }
 0x253   : > { %v1224_v31 = vadd.f32 %v1218_v8, %v1191_v29 }
 0x254   : > { %v1157_v62 = vpop.f32.mrf.mxu1  ;;  %2708 = vmatmul.msk.f32.gmra.mxu0 %vm324_vm0, %v1611_v60 }
 0x255   : > { %2712 = vmatmul.msk.f32.gmra.mxu2 %vm324_vm0, %v2022_v3  ;;  %2714 = vmatmul.msk.f32.gmra.mxu3 %vm324_vm0, %v2271_v10  ;;  %v1158_v1 = vadd.f32 %v1157_v62, %v1128_v9 }
 0x257   : > { %2710 = vmatmul.msk.f32.gmra.mxu1 %vm324_vm0, %v1989_v4 }
 0x258   : > { %v1188_v61 = vpop.f32.mrf.mxu2  ;;  %v1221_v63 = vpop.f32.mrf.mxu3 }
 0x259   : > { %v1251_v15 = vpop.f32.mrf.mxu0  ;;  %v1192_v11 = vadd.f32 %v1188_v61, %v1158_v1 }
 0x25a   : > { %v1257_v32 = vadd.f32 %v1251_v15, %v1224_v31 }
 0x25b   : > { %v1225_v40 = vadd.f32 %v1221_v63, %v1192_v11 }
 0x25c   : > { %v1284_v16 = vpop.f32.mrf.mxu1 }
 0x25d   : > { %v1290_v12 = vadd.f32 %v1284_v16, %v1257_v32 }
 0x260   : > { %v1317_v17 = vpop.f32.mrf.mxu2  ;;  %v1350_v18 = vpop.f32.mrf.mxu3 }
 0x261   : > { %v1254_v19 = vpop.f32.mrf.mxu0  ;;  %v1323_v39 = vadd.f32 %v1317_v17, %v1290_v12 }
 0x262   : > { %v1258_v45 = vadd.f32 %v1254_v19, %v1225_v40 }
 0x263   : > { %v1356_v44 = vadd.f32 %v1350_v18, %v1323_v39 }
 0x264   : > { %v1287_v20 = vpop.f32.mrf.mxu1 }
 0x265   : > { %v1291_v52 = vadd.f32 %v1287_v20, %v1258_v45 }
 0x268   : > { %v1320_v21 = vpop.f32.mrf.mxu2  ;;  %v1353_v22 = vpop.f32.mrf.mxu3 }
 0x269   : > { %v1383_v23 = vpop.f32.mrf.mxu0  ;;  %v1324_v54 = vadd.f32 %v1320_v21, %v1291_v52 }
 0x26a   : > { %v1389_v47 = vadd.f32 %v1383_v23, %v1356_v44 }
 0x26b   : > { %v1357_v3 = vadd.f32 %v1353_v22, %v1324_v54 }
 0x26c   : > { %v1415_v24 = vpop.f32.mrf.mxu1  ;;  %v1394_v55 = vadd.f32 %v3507_v48, %v1389_v47 }
 0x26e   : > { %v1396_v4 = vmax.f32 %v1394_v55, 0.0 }
 0x270   : > { %v1438_v27 = vpop.f32.mrf.mxu2  ;;  %v1469_v28 = vpop.f32.mrf.mxu3  ;;  %v1649_v9 = vrot.slane %v1396_v4, 1  ;;  %v1650_v63 = vrot.slane %v1396_v4, 2  ;;  %v1651_v15 = vrot.slane %v1396_v4, 3  ;;  %v1652_v16 = vrot.slane %v1396_v4, 4 }
 0x271   : > { %v1386_v25 = vpop.f32.mrf.mxu0  ;;  %v1439_v34 = vadd.f32 %v1438_v27, %v1415_v24  ;;  %v1654_v39 = vrot.slane %v1396_v4, 6 }
 0x272   : > { %v1390_v7 = vadd.f32 %v1386_v25, %v1357_v3 }
 0x273   : > { %v1475_v13 = vadd.f32 %v1469_v28, %v1439_v34 }
 0x274   : > { %v1418_v30 = vpop.f32.mrf.mxu1  ;;  %v1395_v19 = vadd.f32 %v3507_v48, %v1390_v7 }
 0x278   : > { %v1441_v36 = vpop.f32.mrf.mxu2  ;;  %v1472_v37 = vpop.f32.mrf.mxu3 }
 0x279   : > { %v1494_v38 = vpop.f32.mrf.mxu0  ;;  %v1442_v41 = vadd.f32 %v1441_v36, %v1418_v30  ;;  %v1653_v36 = vrot.slane %v1396_v4, 5 }
 0x27a   : > { %v1500_v35 = vadd.f32 %v1494_v38, %v1475_v13 }
 0x27b   : > { %v1476_v49 = vadd.f32 %v1472_v37, %v1442_v41 }
 0x27c   : > { %v1519_v14 = vpop.f32.mrf.mxu1 }
 0x27d   : > { %v1525_v46 = vadd.f32 %v1519_v14, %v1500_v35 }
 0x280   : > { %v1552_v33 = vpop.f32.mrf.mxu2  ;;  %v1577_v42 = vpop.f32.mrf.mxu3 }
 0x281   : > { %v1497_v43 = vpop.f32.mrf.mxu0  ;;  %v1558_v50 = vadd.f32 %v1552_v33, %v1525_v46 }
 0x282   : > { %v1501_v53 = vadd.f32 %v1497_v43, %v1476_v49  ;;  %v1397_v43 = vmax.f32 %v1395_v19, 0.0 }
 0x283   : > { %v1583_v56 = vadd.f32 %v1577_v42, %v1558_v50  ;;  %v1655_v42 = vrot.slane %v1396_v4, 7 }
 0x284   : > { %v1522_v51 = vpop.f32.mrf.mxu1  ;;  %v1656_v52 = vrot.slane %v1397_v43, 1  ;;  %v1658_v54 = vrot.slane %v1397_v43, 3  ;;  %v1659_v55 = vrot.slane %v1397_v43, 4 }
 0x285   : > { %v1526_v60 = vadd.f32 %v1522_v51, %v1501_v53  ;;  %v1657_v53 = vrot.slane %v1397_v43, 2 }
 0x288   : > { %v1555_v57 = vpop.f32.mrf.mxu2  ;;  %v1580_v58 = vpop.f32.mrf.mxu3 }
 0x289   : > { %v1602_v59 = vpop.f32.mrf.mxu0  ;;  %v1559_v5 = vadd.f32 %v1555_v57, %v1526_v60 }
 0x28a   : > { %v1608_v2 = vadd.f32 %v1602_v59, %v1583_v56 }
 0x28b   : > { %v1584_v10 = vadd.f32 %v1580_v58, %v1559_v5 }
 0x28c   : > { %v1635_v6 = vpop.f32.mrf.mxu1 }
 0x28d   : > { %v1641_v0 = vadd.f32 %v1635_v6, %v1608_v2 }
 0x28f   : > { %v1643_v8 = vadd.f32 %v1641_v0, %v3507_v48 }
 0x290   : > { %v3511_v62 = vpop.f32.mrf.mxu2  ;;  %v3513_v61 = vpop.f32.mrf.mxu3 }
 0x291   : > { %v1645_v17 = vmax.f32 %v1643_v8, 0.0  ;;  %v1605_v18 = vpop.f32.mrf.mxu0 }
 0x292   : > { %v1609_v20 = vadd.f32 %v1605_v18, %v1584_v10  ;;  %v1660_v10 = vrot.slane %v1397_v43, 5 }
 0x293   : > { %v1679_v21 = vrot.slane %v1645_v17, 1  ;;  %v1680_v22 = vrot.slane %v1645_v17, 2  ;;  %v1681_v23 = vrot.slane %v1645_v17, 3  ;;  %v1682_v24 = vrot.slane %v1645_v17, 4 }
 0x294   : > { %v1683_v26 = vrot.slane %v1645_v17, 5  ;;  %v1684_v27 = vrot.slane %v1645_v17, 6  ;;  %v1685_v28 = vrot.slane %v1645_v17, 7  ;;  %v1693_v25 = vperm.slane %v1645_v17, 0  ;;  %v1638_v29 = vpop.f32.mrf.mxu1 }
 0x295   : > { %v1694_v30 = vperm.slane %v1679_v21, 0  ;;  %v1695_v31 = vperm.slane %v1680_v22, 0  ;;  %v1696_v32 = vperm.slane %v1681_v23, 0  ;;  %v1697_v34 = vperm.slane %v1682_v24, 0 }
 0x296   : > { %v1698_v37 = vperm.slane %v1683_v26, 0  ;;  %v1699_v38 = vperm.slane %v1684_v27, 0  ;;  %v1726_v1 = vsel %vm1725_vm14, %v1396_v4, %v1693_v25  ;;  %v1700_v11 = vperm.slane %v1685_v28, 0 }
 0x297   : > { %v1727_v12 = vsel %vm1725_vm14, %v1649_v9, %v1694_v30  ;;  %v1728_v13 = vsel %vm1725_vm14, %v1650_v63, %v1695_v31  ;;  %v1729_v14 = vsel %vm1725_vm14, %v1651_v15, %v1696_v32  ;;  %1743 = vst.msk [vmem:[%s2998_s22] sm:$0x3] %vm1742_vm15, %v1726_v1  ;;  %v1730_v35 = vsel %vm1725_vm14, %v1652_v16, %v1697_v34 }
 0x298   : > { %1744 = vst.msk [vmem:[%s2998_s22 + $0x2] sm:$0x3] %vm1742_vm15, %v1727_v12  ;;  %v1642_v40 = vadd.f32 %v1638_v29, %v1609_v20  ;;  %v3525_v41 = vpop.f32.mrf.mxu2  ;;  %v3527_v33 = vpop.f32.mrf.mxu3  ;;  %v1731_v44 = vsel %vm1725_vm14, %v1653_v36, %v1698_v37  ;;  %v1732_v46 = vsel %vm1725_vm14, %v1654_v39, %v1699_v38  ;;  %v1733_v49 = vsel %vm1725_vm14, %v1655_v42, %v1700_v11 }
 0x299   : > { %1745 = vst.msk [vmem:[%s2998_s22 + $0x4] sm:$0x3] %vm1742_vm15, %v1728_v13  ;;  %v3532_v45 = vpop.f32.mrf.mxu0  ;;  %v1661_v22 = vrot.slane %v1397_v43, 6  ;;  %v1662_v24 = vrot.slane %v1397_v43, 7  ;;  %v1816_v1 = vadd.f32 %v3513_v61, %v3511_v62 }
 0x29a   : > { %1746 = vst.msk [vmem:[%s2998_s22 + $0x6] sm:$0x3] %vm1742_vm15, %v1729_v14  ;;  %v1644_v47 = vadd.f32 %v1642_v40, %v3507_v48 }
 0x29b   : > { %1747 = vst.msk [vmem:[%s2998_s22 + $0x8] sm:$0x3] %vm1742_vm15, %v1730_v35  ;;  %v1852_v13 = vadd.f32 %v3532_v45, %v1816_v1 }
 0x29c   : > { %1748 = vst.msk [vmem:[%s2998_s22 + $0xa] sm:$0x3] %vm1742_vm15, %v1731_v44  ;;  %v1646_v50 = vmax.f32 %v1644_v47, 0.0  ;;  %v1879_v51 = vpop.f32.mrf.mxu1 }
 0x29d   : > { %1749 = vst.msk [vmem:[%s2998_s22 + $0xc] sm:$0x3] %vm1742_vm15, %v1732_v46  ;;  %v1885_v35 = vadd.f32 %v1879_v51, %v1852_v13 }
 0x29e   : > { %1750 = vst.msk [vmem:[%s2998_s22 + $0xe] sm:$0x3] %vm1742_vm15, %v1733_v49  ;;  %v1686_v56 = vrot.slane %v1646_v50, 1  ;;  %v1687_v57 = vrot.slane %v1646_v50, 2  ;;  %v1688_v58 = vrot.slane %v1646_v50, 3  ;;  %v1689_v59 = vrot.slane %v1646_v50, 4 }
 0x29f   : > { %v1690_v60 = vrot.slane %v1646_v50, 5  ;;  %v1691_v2 = vrot.slane %v1646_v50, 6  ;;  %v1692_v3 = vrot.slane %v1646_v50, 7  ;;  %v1701_v4 = vperm.slane %v1646_v50, 0 }
 0x2a0   : > { %v1702_v5 = vperm.slane %v1686_v56, 0  ;;  %v1703_v6 = vperm.slane %v1687_v57, 0  ;;  %v1704_v0 = vperm.slane %v1688_v58, 0  ;;  %v1705_v7 = vperm.slane %v1689_v59, 0  ;;  %v1912_v8 = vpop.f32.mrf.mxu2  ;;  %v1945_v9 = vpop.f32.mrf.mxu3 }
 0x2a1   : > { %v1706_v63 = vperm.slane %v1690_v60, 0  ;;  %v1707_v15 = vperm.slane %v1691_v2, 0  ;;  %v1734_v16 = vsel %vm1725_vm14, %v1397_v43, %v1701_v4  ;;  %v1849_v17 = vpop.f32.mrf.mxu0  ;;  %v1708_v18 = vperm.slane %v1692_v3, 0 }
 0x2a2   : > { %v1735_v19 = vsel %vm1725_vm14, %v1656_v52, %v1702_v5  ;;  %v1736_v20 = vsel %vm1725_vm14, %v1657_v53, %v1703_v6  ;;  %v1737_v21 = vsel %vm1725_vm14, %v1658_v54, %v1704_v0  ;;  %1751 = vst.msk [vmem:[%s2998_s22 + $0x20] sm:$0x3] %vm1742_vm15, %v1734_v16  ;;  %v1738_v23 = vsel %vm1725_vm14, %v1659_v55, %v1705_v7 }
 0x2a3   : > { %1752 = vst.msk [vmem:[%s2998_s22 + $0x22] sm:$0x3] %vm1742_vm15, %v1735_v19  ;;  %v1739_v26 = vsel %vm1725_vm14, %v1660_v10, %v1706_v63  ;;  %v1740_v28 = vsel %vm1725_vm14, %v1661_v22, %v1707_v15  ;;  %v1741_v25 = vsel %vm1725_vm14, %v1662_v24, %v1708_v18  ;;  %v1918_v40 = vadd.f32 %v1912_v8, %v1885_v35 }
 0x2a4   : > { %1753 = vst.msk [vmem:[%s2998_s22 + $0x24] sm:$0x3] %vm1742_vm15, %v1736_v20  ;;  %v1882_v27 = vpop.f32.mrf.mxu1  ;;  %v1819_v43 = vadd.f32 %v3527_v33, %v3525_v41 }
 0x2a5   : > { %1754 = vst.msk [vmem:[%s2998_s22 + $0x26] sm:$0x3] %vm1742_vm15, %v1737_v21  ;;  %v1951_v50 = vadd.f32 %v1945_v9, %v1918_v40 }
 0x2a6   : > { %1755 = vst.msk [vmem:[%s2998_s22 + $0x28] sm:$0x3] %vm1742_vm15, %v1738_v23  ;;  %v1853_v49 = vadd.f32 %v1849_v17, %v1819_v43 }
 0x2a7   : > { %1756 = vst.msk [vmem:[%s2998_s22 + $0x2a] sm:$0x3] %vm1742_vm15, %v1739_v26 }
 0x2a8   : > { %1757 = vst.msk [vmem:[%s2998_s22 + $0x2c] sm:$0x3] %vm1742_vm15, %v1740_v28  ;;  %v1915_v29 = vpop.f32.mrf.mxu2  ;;  %v1948_v30 = vpop.f32.mrf.mxu3  ;;  %v1886_v54 = vadd.f32 %v1882_v27, %v1853_v49 }
 0x2a9   : > { %1758 = vst.msk [vmem:[%s2998_s22 + $0x2e] sm:$0x3] %vm1742_vm15, %v1741_v25  ;;  %v1979_v31 = vpop.f32.mrf.mxu0 }
 0x2aa   : > { %v1985_v62 = vadd.f32 %v1979_v31, %v1951_v50  ;;  %v1919_v55 = vadd.f32 %v1915_v29, %v1886_v54 }
 0x2ac   : > { %v2013_v32 = vpop.f32.mrf.mxu1  ;;  %v1952_v2 = vadd.f32 %v1948_v30, %v1919_v55 }
 0x2ad   : > { %v2019_v57 = vadd.f32 %v2013_v32, %v1985_v62 }
 0x2b0   : > { %v2046_v34 = vpop.f32.mrf.mxu2  ;;  %v2075_v36 = vpop.f32.mrf.mxu3 }
 0x2b1   : > { %v1982_v37 = vpop.f32.mrf.mxu0  ;;  %v2052_v59 = vadd.f32 %v2046_v34, %v2019_v57 }
 0x2b2   : > { %v1986_v3 = vadd.f32 %v1982_v37, %v1952_v2 }
 0x2b3   : > { %v2054_v4 = vadd.f32 %v2052_v59, %v3507_v48 }
 0x2b4   : > { %v2016_v38 = vpop.f32.mrf.mxu1 }
 0x2b5   : > { %v2020_v9 = vadd.f32 %v2016_v38, %v1986_v3  ;;  %v2056_v63 = vmax.f32 %v2054_v4, 0.0 }
 0x2b7   : > { %v2309_v20 = vrot.slane %v2056_v63, 1  ;;  %v2310_v21 = vrot.slane %v2056_v63, 2  ;;  %v2311_v22 = vrot.slane %v2056_v63, 3  ;;  %v2312_v24 = vrot.slane %v2056_v63, 4 }
 0x2b8   : > { %v2049_v11 = vpop.f32.mrf.mxu2  ;;  %v2078_v12 = vpop.f32.mrf.mxu3  ;;  %v2313_v26 = vrot.slane %v2056_v63, 5  ;;  %v2314_v50 = vrot.slane %v2056_v63, 6  ;;  %v2315_v62 = vrot.slane %v2056_v63, 7 }
 0x2b9   : > { %v2098_v14 = vpop.f32.mrf.mxu0  ;;  %v2053_v16 = vadd.f32 %v2049_v11, %v2020_v9 }
 0x2ba   : > { %v2099_v42 = vadd.f32 %v2098_v14, %v2075_v36 }
 0x2bb   : > { %v2055_v27 = vadd.f32 %v2053_v16, %v3507_v48 }
 0x2bc   : > { %v2129_v39 = vpop.f32.mrf.mxu1 }
 0x2bd   : > { %v2135_v52 = vadd.f32 %v2129_v39, %v2099_v42 }
 0x2c0   : > { %v2154_v44 = vpop.f32.mrf.mxu2  ;;  %v2179_v46 = vpop.f32.mrf.mxu3 }
 0x2c1   : > { %v2101_v47 = vpop.f32.mrf.mxu0  ;;  %v2160_v61 = vadd.f32 %v2154_v44, %v2135_v52 }
 0x2c2   : > { %v2102_v41 = vadd.f32 %v2101_v47, %v2078_v12 }
 0x2c3   : > { %v2185_v51 = vadd.f32 %v2179_v46, %v2160_v61 }
 0x2c4   : > { %v2132_v53 = vpop.f32.mrf.mxu1 }
 0x2c5   : > { %v2136_v6 = vadd.f32 %v2132_v53, %v2102_v41 }
 0x2c8   : > { %v2157_v45 = vpop.f32.mrf.mxu2  ;;  %v2182_v56 = vpop.f32.mrf.mxu3 }
 0x2c9   : > { %v2212_v58 = vpop.f32.mrf.mxu0  ;;  %v2161_v10 = vadd.f32 %v2157_v45, %v2136_v6  ;;  %v2057_v45 = vmax.f32 %v2055_v27, 0.0 }
 0x2ca   : > { %v2218_v60 = vadd.f32 %v2212_v58, %v2185_v51 }
 0x2cb   : > { %v2186_v19 = vadd.f32 %v2182_v56, %v2161_v10  ;;  %v2316_v58 = vrot.slane %v2057_v45, 1  ;;  %v2317_v59 = vrot.slane %v2057_v45, 2  ;;  %v2319_v2 = vrot.slane %v2057_v45, 4 }
 0x2cc   : > { %v2237_v33 = vpop.f32.mrf.mxu1 }
 0x2cd   : > { %v2243_v5 = vadd.f32 %v2237_v33, %v2218_v60  ;;  %v2318_v60 = vrot.slane %v2057_v45, 3 }
 0x2d0   : > { %v2262_v0 = vpop.f32.mrf.mxu2  ;;  %v2295_v7 = vpop.f32.mrf.mxu3 }
 0x2d1   : > { %v2268_v8 = vadd.f32 %v2262_v0, %v2243_v5  ;;  %v2215_v17 = vpop.f32.mrf.mxu0 }
 0x2d2   : > { %v2219_v28 = vadd.f32 %v2215_v17, %v2186_v19 }
 0x2d3   : > { %v2301_v15 = vadd.f32 %v2295_v7, %v2268_v8 }
 0x2d4   : > { %v2240_v32 = vpop.f32.mrf.mxu1 }
 0x2d5   : > { %v2303_v18 = vadd.f32 %v2301_v15, %v3507_v48  ;;  %v2244_v42 = vadd.f32 %v2240_v32, %v2219_v28 }
 0x2d7   : > { %v2305_v23 = vmax.f32 %v2303_v18, 0.0 }
 0x2d8   : > { %v2265_v14 = vpop.f32.mrf.mxu2  ;;  %v2298_v49 = vpop.f32.mrf.mxu3 }
 0x2d9   : > { %v2339_v25 = vrot.slane %v2305_v23, 1  ;;  %v2340_v29 = vrot.slane %v2305_v23, 2  ;;  %v2341_v30 = vrot.slane %v2305_v23, 3  ;;  %v2342_v31 = vrot.slane %v2305_v23, 4 }
 0x2da   : > { %v2343_v34 = vrot.slane %v2305_v23, 5  ;;  %v2344_v36 = vrot.slane %v2305_v23, 6  ;;  %v2345_v37 = vrot.slane %v2305_v23, 7  ;;  %v2353_v38 = vperm.slane %v2305_v23, 0 }
 0x2db   : > { %v2354_v1 = vperm.slane %v2339_v25, 0  ;;  %v2355_v11 = vperm.slane %v2340_v29, 0  ;;  %v2356_v12 = vperm.slane %v2341_v30, 0  ;;  %v2357_v13 = vperm.slane %v2342_v31, 0 }
 0x2dc   : > { %v2358_v39 = vperm.slane %v2343_v34, 0  ;;  %v2359_v35 = vperm.slane %v2344_v36, 0  ;;  %v2385_v40 = vsel %vm1725_vm14, %v2056_v63, %v2353_v38  ;;  %v2360_v43 = vperm.slane %v2345_v37, 0 }
 0x2dd   : > { %v2386_v44 = vsel %vm1725_vm14, %v2309_v20, %v2354_v1  ;;  %v2387_v46 = vsel %vm1725_vm14, %v2310_v21, %v2355_v11  ;;  %v2388_v47 = vsel %vm1725_vm14, %v2311_v22, %v2356_v12  ;;  %2715 = vst.msk [vmem:[%s2998_s22 + $0x10] sm:$0x3] %vm1742_vm15, %v2385_v40  ;;  %v2389_v52 = vsel %vm1725_vm14, %v2312_v24, %v2357_v13 }
 0x2de   : > { %2716 = vst.msk [vmem:[%s2998_s22 + $0x12] sm:$0x3] %vm1742_vm15, %v2386_v44  ;;  %v2269_v53 = vadd.f32 %v2265_v14, %v2244_v42  ;;  %v2390_v61 = vsel %vm1725_vm14, %v2313_v26, %v2358_v39  ;;  %v2391_v54 = vsel %vm1725_vm14, %v2314_v50, %v2359_v35  ;;  %v2392_v56 = vsel %vm1725_vm14, %v2315_v62, %v2360_v43 }
 0x2df   : > { %2717 = vst.msk [vmem:[%s2998_s22 + $0x14] sm:$0x3] %vm1742_vm15, %v2387_v46  ;;  %v2320_v63 = vrot.slane %v2057_v45, 5  ;;  %v2321_v22 = vrot.slane %v2057_v45, 6  ;;  %v2322_v24 = vrot.slane %v2057_v45, 7 }
 0x2e0   : > { %2718 = vst.msk [vmem:[%s2998_s22 + $0x16] sm:$0x3] %vm1742_vm15, %v2388_v47  ;;  %v2302_v55 = vadd.f32 %v2298_v49, %v2269_v53 }
 0x2e1   : > { %2719 = vst.msk [vmem:[%s2998_s22 + $0x18] sm:$0x3] %vm1742_vm15, %v2389_v52 }
 0x2e2   : > { %2720 = vst.msk [vmem:[%s2998_s22 + $0x1a] sm:$0x3] %vm1742_vm15, %v2390_v61  ;;  %v2304_v57 = vadd.f32 %v2302_v55, %v3507_v48 }
 0x2e3   : > { %2721 = vst.msk [vmem:[%s2998_s22 + $0x1c] sm:$0x3] %vm1742_vm15, %v2391_v54 }
 0x2e4   : > { %2722 = vst.msk [vmem:[%s2998_s22 + $0x1e] sm:$0x3] %vm1742_vm15, %v2392_v56  ;;  %v2306_v51 = vmax.f32 %v2304_v57, 0.0 }
 0x2e6   : > { %v2346_v41 = vrot.slane %v2306_v51, 1  ;;  %v2347_v33 = vrot.slane %v2306_v51, 2  ;;  %v2348_v3 = vrot.slane %v2306_v51, 3  ;;  %v2349_v4 = vrot.slane %v2306_v51, 4 }
 0x2e7   : > { %v2350_v5 = vrot.slane %v2306_v51, 5  ;;  %v2351_v6 = vrot.slane %v2306_v51, 6  ;;  %v2352_v0 = vrot.slane %v2306_v51, 7  ;;  %v2361_v7 = vperm.slane %v2306_v51, 0 }
 0x2e8   : > { %v2362_v48 = vperm.slane %v2346_v41, 0  ;;  %v2363_v8 = vperm.slane %v2347_v33, 0  ;;  %v2364_v9 = vperm.slane %v2348_v3, 0  ;;  %v2365_v10 = vperm.slane %v2349_v4, 0 }
 0x2e9   : > { %v2366_v15 = vperm.slane %v2350_v5, 0  ;;  %v2367_v16 = vperm.slane %v2351_v6, 0  ;;  %v2393_v17 = vsel %vm1725_vm14, %v2057_v45, %v2361_v7  ;;  %v2368_v18 = vperm.slane %v2352_v0, 0 }
 0x2ea   : > { %v2394_v19 = vsel %vm1725_vm14, %v2316_v58, %v2362_v48  ;;  %v2395_v20 = vsel %vm1725_vm14, %v2317_v59, %v2363_v8  ;;  %v2396_v21 = vsel %vm1725_vm14, %v2318_v60, %v2364_v9  ;;  %2723 = vst.msk [vmem:[%s2998_s22 + $0x30] sm:$0x3] %vm1742_vm15, %v2393_v17  ;;  %v2397_v23 = vsel %vm1725_vm14, %v2319_v2, %v2365_v10 }
 0x2eb   : > { %2724 = vst.msk [vmem:[%s2998_s22 + $0x32] sm:$0x3] %vm1742_vm15, %v2394_v19  ;;  %v2398_v26 = vsel %vm1725_vm14, %v2320_v63, %v2366_v15  ;;  %v2399_v27 = vsel %vm1725_vm14, %v2321_v22, %v2367_v16  ;;  %v2400_v28 = vsel %vm1725_vm14, %v2322_v24, %v2368_v18 }
 0x2ec   : > { %2725 = vst.msk [vmem:[%s2998_s22 + $0x34] sm:$0x3] %vm1742_vm15, %v2395_v20 }
 0x2ed   : > { %2726 = vst.msk [vmem:[%s2998_s22 + $0x36] sm:$0x3] %vm1742_vm15, %v2396_v21 }
 0x2ee   : > { %2727 = vst.msk [vmem:[%s2998_s22 + $0x38] sm:$0x3] %vm1742_vm15, %v2397_v23 }
 0x2ef   : > { %2728 = vst.msk [vmem:[%s2998_s22 + $0x3a] sm:$0x3] %vm1742_vm15, %v2398_v26 }
 0x2f0   : > { %2729 = vst.msk [vmem:[%s2998_s22 + $0x3c] sm:$0x3] %vm1742_vm15, %v2399_v27 }
 0x2f1   : > { %2730 = vst.msk [vmem:[%s2998_s22 + $0x3e] sm:$0x3] %vm1742_vm15, %v2400_v28 }
 0x2f2 PF: > { %s16_s25 = sadd.s32 1, %s2823_s25   ;;  %s3650_s21 = smov %s2815_s23 }
 0x2f3   : > { %p13_p9 = scmp.ge.s32.totalorder %s16_s25, 10   ;;  %s3651_s22 = smov %s2819_s24 }
 0x2f4   : > { %s3652_s23 = smov %s3655_s26  ;;  %s3653_s24 = smov %s3659_s27 }
 0x2f5   :  { %15 = sbr.rel (!%p13_p9) target bundleno = 3 (0x3), region = 121 }

</bundles_post_ra>
